<compile_context>
chip_gen: v5e
topology: v5e:2x2
jax: 0.10.0
libtpu: 0.0.40
codegen_flags: <defaults>
</compile_context>

<pallas_src>
import jax
import jax.numpy as jnp
from jax.experimental import pallas as pl
from jax.experimental.pallas import tpu as pltpu

_DIMS = [(5, 10), (10, 20), (20, 30), (30, 20), (20, 10), (10, 3)]


def _round_up(a, m):
    return ((a + m - 1) // m) * m


def _cdiv(a, b):
    return -(-a // b)


def _make_kernel(bias_offsets, bias_sizes):
    """Kernel over one lane tile.  Activations are (k*features, T): batch in the lane
    dim, k packed sub-batches stacked along the sublane dim."""
    n_layers = len(bias_sizes)

    def kernel(x_ref, *refs):
        w_refs = refs[:n_layers]          # block-diagonal bf16 weights, VMEM-resident
        b_ref = refs[n_layers]            # (sum_k_out, 1) fp32 bias slab
        o_ref = refs[n_layers + 1]        # (k*3, T) fp32 output tile

        h = x_ref[...]                    # (k*5, T) bf16
        for l in range(n_layers):
            off, sz = bias_offsets[l], bias_sizes[l]
            # Block-diag weight @ packed activations; fp32 accumulation on the MXU.
            y = jnp.dot(w_refs[l][...], h, preferred_element_type=jnp.float32)
            # Static slice of the bias slab (free) + one lane-broadcast per layer.
            y = y + b_ref[off:off + sz, :]
            if l < n_layers - 1:
                h = jnp.maximum(y, 0.0).astype(jnp.bfloat16)   # fp32 ReLU, bf16 MXU input
            else:
                o_ref[...] = y            # lane-dense, unmasked fp32 store

    return kernel


def qnn_forward(x, params, *, tile_lanes=2048, pack_k=8):
    """x: (B, 5) float32.  params: list of (W, b), W shaped (in, out), b shaped (1, out).

    pack_k: number of batch sub-chunks packed into the sublane dim (8 for the 256-wide
    MXU on v6e/v7x, 4 for the 128-wide MXU on v5e).
    tile_lanes: lanes per grid step (sweep 1024-8192 for throughput runs)."""
    B, n_in = x.shape
    assert n_in == _DIMS[0][0]
    k = max(1, int(pack_k))

    # ---- lane / tile geometry ------------------------------------------------------
    lanes_needed = _round_up(max(_cdiv(B, k), 1), 128)       # packed lanes to hold B
    t = _round_up(max(int(tile_lanes), 128), 128)            # enforce lane divisibility
    t = min(t, lanes_needed)
    if lanes_needed > 128 and t >= lanes_needed:
        # Keep >=2 grid steps so v7x can split the "parallel" axis across both TCs.
        t = _round_up(_cdiv(lanes_needed, 2), 128)
    n_steps = _cdiv(lanes_needed, t)
    lanes_total = n_steps * t
    b_pad = lanes_total * k

    # ---- pack the input: (B,5) -> (5, b_pad) feature-major -> (k*5, lanes_total) ----
    x_t = jnp.zeros((n_in, b_pad), jnp.bfloat16).at[:, :B].set(x.astype(jnp.bfloat16).T)
    x_packed = (x_t.reshape(n_in, k, lanes_total)
                   .transpose(1, 0, 2)
                   .reshape(k * n_in, lanes_total))

    # ---- block-diagonal bf16 weights + single fp32 bias slab -------------------------
    eye_k = jnp.eye(k, dtype=jnp.float32)
    w_ops, w_specs = [], []
    bias_rows, bias_offsets, bias_sizes = [], [], []
    off = 0
    for (w, b) in params:
        fan_in, fan_out = w.shape
        w_bd = jnp.kron(eye_k, w.astype(jnp.float32).T).astype(jnp.bfloat16)  # (k*out, k*in)
        w_ops.append(w_bd)
        # Constant index_map: fetched once, stays VMEM-resident across all grid steps.
        w_specs.append(pl.BlockSpec(w_bd.shape, lambda i: (0, 0)))
        bias_rows.append(jnp.tile(b.astype(jnp.float32).reshape(-1, 1), (k, 1)))
        bias_offsets.append(off)
        bias_sizes.append(k * fan_out)
        off += k * fan_out
    b_slab = jnp.concatenate(bias_rows, axis=0)               # (k*93, 1) fp32
    b_spec = pl.BlockSpec(b_slab.shape, lambda i: (0, 0))

    n_out = _DIMS[-1][1]
    out_packed = pl.pallas_call(
        _make_kernel(tuple(bias_offsets), tuple(bias_sizes)),
        out_shape=jax.ShapeDtypeStruct((k * n_out, lanes_total), jnp.float32),
        grid=(n_steps,),
        in_specs=[pl.BlockSpec((k * n_in, t), lambda i: (0, i))] + w_specs + [b_spec],
        out_specs=pl.BlockSpec((k * n_out, t), lambda i: (0, i)),
        compiler_params=pltpu.CompilerParams(
            dimension_semantics=("parallel",),
            vmem_limit_bytes=32 * 1024 * 1024,
        ),
    )(x_packed, *w_ops, b_slab)

    # ---- unpack: (k*3, lanes_total) -> (3, b_pad) -> (B, 3); drop padded tail --------
    out = (out_packed.reshape(k, n_out, lanes_total)
                     .transpose(1, 0, 2)
                     .reshape(n_out, b_pad))
    return out.T[:B]


def init_params(key):
    """Deterministic init mimicking PyTorch nn.Linear default (uniform +-1/sqrt(fan_in))."""
    params = []
    for (fan_in, fan_out) in _DIMS:
        key, kw, kb = jax.random.split(key, 3)
        bound = 1.0 / jnp.sqrt(fan_in)
        w = jax.random.uniform(kw, (fan_in, fan_out), jnp.float32, -bound, bound)
        b = jax.random.uniform(kb, (1, fan_out), jnp.float32, -bound, bound)
        params.append((w, b))
    return params


def qnn_reference(x, params):
    """Pure-JAX reference with the same numerics as the kernel:
    bf16 inputs/weights, fp32 accumulation, fp32 bias add + ReLU."""
    h = x.astype(jnp.bfloat16)
    n = len(params)
    for i, (w, b) in enumerate(params):
        y = jnp.dot(h, w.astype(jnp.bfloat16),
                    preferred_element_type=jnp.float32) + b.astype(jnp.float32)
        if i < n - 1:
            h = jnp.maximum(y, 0.0).astype(jnp.bfloat16)
        else:
            h = y
    return h


if __name__ == "__main__":
    key = jax.random.PRNGKey(0)
    kx, kp = jax.random.split(key)
    params = init_params(kp)

    # (B, pack_k): single-step grid, tail padding, and a multi-step grid with k=4.
    for B, kk in ((8, 8), (300, 8), (2500, 4)):
        kx, kb = jax.random.split(kx)
        x = jax.random.normal(kb, (B, 5), jnp.float32)

        out = jax.block_until_ready(qnn_forward(x, params, tile_lanes=2048, pack_k=kk))
        ref = qnn_reference(x, params)

        assert out.shape == (B, 3)
        err = float(jnp.max(jnp.abs(out - ref)))
        assert jnp.allclose(out, ref, atol=1e-2, rtol=1e-2), \
            f"mismatch vs reference (B={B}, k={kk}): max|err|={err}"

    print("KERNEL_OK")
</pallas_src>

<mosaic_0001>
module attributes {stable_mosaic.version = 11 : i64} {
  func.func @kernel(%arg0: i32, %arg1: memref<40x128xbf16, #tpu.memory_space<vmem>>, %arg2: memref<80x40xbf16, #tpu.memory_space<vmem>>, %arg3: memref<160x80xbf16, #tpu.memory_space<vmem>>, %arg4: memref<240x160xbf16, #tpu.memory_space<vmem>>, %arg5: memref<160x240xbf16, #tpu.memory_space<vmem>>, %arg6: memref<80x160xbf16, #tpu.memory_space<vmem>>, %arg7: memref<24x80xbf16, #tpu.memory_space<vmem>>, %arg8: memref<744x1xf32, #tpu.memory_space<vmem>>, %arg9: memref<24x128xf32, #tpu.memory_space<vmem>>) attributes {dimension_semantics = [#tpu.dimension_semantics<parallel>], iteration_bounds = array<i64: 1>, scalar_prefetch = 0 : i64, scratch_operands = 0 : i64, tpu.core_type = #tpu.core_type<tc>, window_params = [{transform_indices = @transform_0, window_bounds = array<i64: 40, 128>}, {pipeline_mode = #tpu.pipeline_mode<synchronous>, transform_indices = @transform_1, window_bounds = array<i64: 80, 40>}, {pipeline_mode = #tpu.pipeline_mode<synchronous>, transform_indices = @transform_2, window_bounds = array<i64: 160, 80>}, {pipeline_mode = #tpu.pipeline_mode<synchronous>, transform_indices = @transform_3, window_bounds = array<i64: 240, 160>}, {pipeline_mode = #tpu.pipeline_mode<synchronous>, transform_indices = @transform_4, window_bounds = array<i64: 160, 240>}, {pipeline_mode = #tpu.pipeline_mode<synchronous>, transform_indices = @transform_5, window_bounds = array<i64: 80, 160>}, {pipeline_mode = #tpu.pipeline_mode<synchronous>, transform_indices = @transform_6, window_bounds = array<i64: 24, 80>}, {pipeline_mode = #tpu.pipeline_mode<synchronous>, transform_indices = @transform_7, window_bounds = array<i64: 744, 1>}, {transform_indices = @transform_8, window_bounds = array<i64: 24, 128>}]} {
    %c0 = arith.constant 0 : index
    %c0_0 = arith.constant 0 : index
    %0 = vector.load %arg1[%c0, %c0_0] : memref<40x128xbf16, #tpu.memory_space<vmem>>, vector<40x128xbf16>
    %c0_1 = arith.constant 0 : index
    %c0_2 = arith.constant 0 : index
    %1 = vector.load %arg2[%c0_1, %c0_2] : memref<80x40xbf16, #tpu.memory_space<vmem>>, vector<80x40xbf16>
    %cst = arith.constant dense<0.000000e+00> : vector<80x128xf32>
    %2 = tpu.matmul %1, %0, %cst {dimension_numbers = #tpu.dot_dimension_numbers<[1], [0], [0], [1], [0, 0, 1, 1], [], []>} : vector<80x40xbf16>, vector<40x128xbf16>, vector<80x128xf32> -> vector<80x128xf32>
    %c0_3 = arith.constant 0 : index
    %c0_4 = arith.constant 0 : index
    %3 = vector.load %arg8[%c0_3, %c0_4] : memref<744x1xf32, #tpu.memory_space<vmem>>, vector<80x1xf32>
    %4 = vector.broadcast %3 : vector<80x1xf32> to vector<80x128xf32>
    %5 = arith.addf %2, %4 : vector<80x128xf32>
    %cst_5 = arith.constant 0.000000e+00 : f32
    %6 = vector.broadcast %cst_5 : f32 to vector<80x128xf32>
    %7 = arith.maximumf %5, %6 : vector<80x128xf32>
    %8 = arith.truncf %7 : vector<80x128xf32> to vector<80x128xbf16>
    %c0_6 = arith.constant 0 : index
    %c0_7 = arith.constant 0 : index
    %9 = vector.load %arg3[%c0_6, %c0_7] : memref<160x80xbf16, #tpu.memory_space<vmem>>, vector<160x80xbf16>
    %cst_8 = arith.constant dense<0.000000e+00> : vector<160x128xf32>
    %10 = tpu.matmul %9, %8, %cst_8 {dimension_numbers = #tpu.dot_dimension_numbers<[1], [0], [0], [1], [0, 0, 1, 1], [], []>} : vector<160x80xbf16>, vector<80x128xbf16>, vector<160x128xf32> -> vector<160x128xf32>
    %c80 = arith.constant 80 : index
    %c0_9 = arith.constant 0 : index
    %11 = vector.load %arg8[%c80, %c0_9] : memref<744x1xf32, #tpu.memory_space<vmem>>, vector<160x1xf32>
    %12 = vector.broadcast %11 : vector<160x1xf32> to vector<160x128xf32>
    %13 = arith.addf %10, %12 : vector<160x128xf32>
    %cst_10 = arith.constant 0.000000e+00 : f32
    %14 = vector.broadcast %cst_10 : f32 to vector<160x128xf32>
    %15 = arith.maximumf %13, %14 : vector<160x128xf32>
    %16 = arith.truncf %15 : vector<160x128xf32> to vector<160x128xbf16>
    %c0_11 = arith.constant 0 : index
    %c0_12 = arith.constant 0 : index
    %17 = vector.load %arg4[%c0_11, %c0_12] : memref<240x160xbf16, #tpu.memory_space<vmem>>, vector<240x160xbf16>
    %cst_13 = arith.constant dense<0.000000e+00> : vector<240x128xf32>
    %18 = tpu.matmul %17, %16, %cst_13 {dimension_numbers = #tpu.dot_dimension_numbers<[1], [0], [0], [1], [0, 0, 1, 1], [], []>} : vector<240x160xbf16>, vector<160x128xbf16>, vector<240x128xf32> -> vector<240x128xf32>
    %c240 = arith.constant 240 : index
    %c0_14 = arith.constant 0 : index
    %19 = vector.load %arg8[%c240, %c0_14] : memref<744x1xf32, #tpu.memory_space<vmem>>, vector<240x1xf32>
    %20 = vector.broadcast %19 : vector<240x1xf32> to vector<240x128xf32>
    %21 = arith.addf %18, %20 : vector<240x128xf32>
    %cst_15 = arith.constant 0.000000e+00 : f32
    %22 = vector.broadcast %cst_15 : f32 to vector<240x128xf32>
    %23 = arith.maximumf %21, %22 : vector<240x128xf32>
    %24 = arith.truncf %23 : vector<240x128xf32> to vector<240x128xbf16>
    %c0_16 = arith.constant 0 : index
    %c0_17 = arith.constant 0 : index
    %25 = vector.load %arg5[%c0_16, %c0_17] : memref<160x240xbf16, #tpu.memory_space<vmem>>, vector<160x240xbf16>
    %cst_18 = arith.constant dense<0.000000e+00> : vector<160x128xf32>
    %26 = tpu.matmul %25, %24, %cst_18 {dimension_numbers = #tpu.dot_dimension_numbers<[1], [0], [0], [1], [0, 0, 1, 1], [], []>} : vector<160x240xbf16>, vector<240x128xbf16>, vector<160x128xf32> -> vector<160x128xf32>
    %c480 = arith.constant 480 : index
    %c0_19 = arith.constant 0 : index
    %27 = vector.load %arg8[%c480, %c0_19] : memref<744x1xf32, #tpu.memory_space<vmem>>, vector<160x1xf32>
    %28 = vector.broadcast %27 : vector<160x1xf32> to vector<160x128xf32>
    %29 = arith.addf %26, %28 : vector<160x128xf32>
    %cst_20 = arith.constant 0.000000e+00 : f32
    %30 = vector.broadcast %cst_20 : f32 to vector<160x128xf32>
    %31 = arith.maximumf %29, %30 : vector<160x128xf32>
    %32 = arith.truncf %31 : vector<160x128xf32> to vector<160x128xbf16>
    %c0_21 = arith.constant 0 : index
    %c0_22 = arith.constant 0 : index
    %33 = vector.load %arg6[%c0_21, %c0_22] : memref<80x160xbf16, #tpu.memory_space<vmem>>, vector<80x160xbf16>
    %cst_23 = arith.constant dense<0.000000e+00> : vector<80x128xf32>
    %34 = tpu.matmul %33, %32, %cst_23 {dimension_numbers = #tpu.dot_dimension_numbers<[1], [0], [0], [1], [0, 0, 1, 1], [], []>} : vector<80x160xbf16>, vector<160x128xbf16>, vector<80x128xf32> -> vector<80x128xf32>
    %c640 = arith.constant 640 : index
    %c0_24 = arith.constant 0 : index
    %35 = vector.load %arg8[%c640, %c0_24] : memref<744x1xf32, #tpu.memory_space<vmem>>, vector<80x1xf32>
    %36 = vector.broadcast %35 : vector<80x1xf32> to vector<80x128xf32>
    %37 = arith.addf %34, %36 : vector<80x128xf32>
    %cst_25 = arith.constant 0.000000e+00 : f32
    %38 = vector.broadcast %cst_25 : f32 to vector<80x128xf32>
    %39 = arith.maximumf %37, %38 : vector<80x128xf32>
    %40 = arith.truncf %39 : vector<80x128xf32> to vector<80x128xbf16>
    %c0_26 = arith.constant 0 : index
    %c0_27 = arith.constant 0 : index
    %41 = vector.load %arg7[%c0_26, %c0_27] : memref<24x80xbf16, #tpu.memory_space<vmem>>, vector<24x80xbf16>
    %cst_28 = arith.constant dense<0.000000e+00> : vector<24x128xf32>
    %42 = tpu.matmul %41, %40, %cst_28 {dimension_numbers = #tpu.dot_dimension_numbers<[1], [0], [0], [1], [0, 0, 1, 1], [], []>} : vector<24x80xbf16>, vector<80x128xbf16>, vector<24x128xf32> -> vector<24x128xf32>
    %c720 = arith.constant 720 : index
    %c0_29 = arith.constant 0 : index
    %43 = vector.load %arg8[%c720, %c0_29] : memref<744x1xf32, #tpu.memory_space<vmem>>, vector<24x1xf32>
    %44 = vector.broadcast %43 : vector<24x1xf32> to vector<24x128xf32>
    %45 = arith.addf %42, %44 : vector<24x128xf32>
    %c0_30 = arith.constant 0 : index
    %c0_31 = arith.constant 0 : index
    %46 = vector.load %arg9[%c0_30, %c0_31] : memref<24x128xf32, #tpu.memory_space<vmem>>, vector<24x128xf32>
    tpu.vector_store %arg9[%c0_30, %c0_31], %45 {strides = array<i32>} : memref<24x128xf32, #tpu.memory_space<vmem>>, vector<24x128xf32>,
    return
  }
  func.func @transform_0(%arg0: i32) -> (i32, i32) {
    %c0_i32 = arith.constant 0 : i32
    %c0_i32_0 = arith.constant 0 : i32
    return %c0_i32, %arg0 : i32, i32
  }
  func.func @transform_1(%arg0: i32) -> (i32, i32) {
    %c0_i32 = arith.constant 0 : i32
    %c0_i32_0 = arith.constant 0 : i32
    %c0_i32_1 = arith.constant 0 : i32
    return %c0_i32, %c0_i32_0 : i32, i32
  }
  func.func @transform_2(%arg0: i32) -> (i32, i32) {
    %c0_i32 = arith.constant 0 : i32
    %c0_i32_0 = arith.constant 0 : i32
    %c0_i32_1 = arith.constant 0 : i32
    return %c0_i32, %c0_i32_0 : i32, i32
  }
  func.func @transform_3(%arg0: i32) -> (i32, i32) {
    %c0_i32 = arith.constant 0 : i32
    %c0_i32_0 = arith.constant 0 : i32
    %c0_i32_1 = arith.constant 0 : i32
    return %c0_i32, %c0_i32_0 : i32, i32
  }
  func.func @transform_4(%arg0: i32) -> (i32, i32) {
    %c0_i32 = arith.constant 0 : i32
    %c0_i32_0 = arith.constant 0 : i32
    %c0_i32_1 = arith.constant 0 : i32
    return %c0_i32, %c0_i32_0 : i32, i32
  }
  func.func @transform_5(%arg0: i32) -> (i32, i32) {
    %c0_i32 = arith.constant 0 : i32
    %c0_i32_0 = arith.constant 0 : i32
    %c0_i32_1 = arith.constant 0 : i32
    return %c0_i32, %c0_i32_0 : i32, i32
  }
  func.func @transform_6(%arg0: i32) -> (i32, i32) {
    %c0_i32 = arith.constant 0 : i32
    %c0_i32_0 = arith.constant 0 : i32
    %c0_i32_1 = arith.constant 0 : i32
    return %c0_i32, %c0_i32_0 : i32, i32
  }
  func.func @transform_7(%arg0: i32) -> (i32, i32) {
    %c0_i32 = arith.constant 0 : i32
    %c0_i32_0 = arith.constant 0 : i32
    %c0_i32_1 = arith.constant 0 : i32
    return %c0_i32, %c0_i32_0 : i32, i32
  }
  func.func @transform_8(%arg0: i32) -> (i32, i32) {
    %c0_i32 = arith.constant 0 : i32
    %c0_i32_0 = arith.constant 0 : i32
    return %c0_i32, %arg0 : i32, i32
  }
}

</mosaic_0001>

<bundles_post_ra>
// kernel: tpu_custom_call.1
= control target key start
LH: loop header
LB: loop body
LE: loop exit
PB: predicated region body
PF: predicated region fallthrough
CT: control target
= control target key end

     0   :  { %v2295_v3 = vmov 0   ;;  %vm162_vm0 = vcmask 1043456   ;;  %s3240_s0 = inlined_call_operand.vmem [shape: bf16[40,128], index: 0, kind: input, shape index: {}]   ;;  %s3241_s1 = inlined_call_operand.vmem [shape: bf16[80,40], index: 1, kind: input, shape index: {}]   ;;  %s3242_s2 = inlined_call_operand.vmem [shape: bf16[160,80], index: 2, kind: input, shape index: {}]   ;;  %s3243_s3 = inlined_call_operand.vmem [shape: bf16[240,160], index: 3, kind: input, shape index: {}]   ;;  %s3244_s4 = inlined_call_operand.vmem [shape: bf16[160,240], index: 4, kind: input, shape index: {}]   ;;  %s3245_s5 = inlined_call_operand.vmem [shape: bf16[80,160], index: 5, kind: input, shape index: {}]   ;;  %s3246_s6 = inlined_call_operand.vmem [shape: bf16[24,80], index: 6, kind: input, shape index: {}]   ;;  %s3247_s7 = inlined_call_operand.vmem [shape: f32[744,1], index: 7, kind: input, shape index: {}]   ;;  %s3248_s8 = inlined_call_operand.hbm [shape: f32[24,128], index: 8, kind: output, shape index: {}]  }
   0x1   :  { %v54_v0 = vld [vmem:[%s3247_s7 + $0x40] sm:$0xff]  ;;  %v52_v1 = vld [vmem:[%s3247_s7 + $0x30] sm:$0xff]  ;;  %2268 = vset.pattern.permute.xlu2 %v2295_v3  ;;  %2267 = vset.pattern.permute.xlu1 %v2295_v3  ;;  %v53_v8 = vld [vmem:[%s3247_s7 + $0x38] sm:$0xff] }
   0x2   :  { %v50_v2 = vld [vmem:[%s3247_s7 + $0x20] sm:$0xff]  ;;  %v35_v4 = vld [vmem:[%s3240_s0 + $0x10] sm:$0xf]  ;;  %2266 = vset.pattern.permute.xlu0 %v2295_v3  ;;  %88 = vperm.xlu1 %2267, %v52_v1  }
   0x3   :  { %v140_v5 = vunpack.c.l.b16 %v35_v4  ;;  %98 = vperm.xlu0 %2266, %v54_v0   ;;  %78 = vperm.xlu2 %2268, %v50_v2  }
   0x5   :  { %v143_v6 = vpack.c.b16 %v140_v5, %v140_v5 }
   0x7   :  { %v164_v7 = vsel %vm162_vm0, %v143_v6, 0 }
   0x8   :  { %171 = vmatpush.bf16.msra.mxu0 %v164_v7 }
   0x9   :  { %13 = vsyncpa [#allocation3], 0  ;;  %v55_v9 = vld [vmem:[%s3247_s7 + $0x48] sm:$0xff]  ;;  %v2184_v12 = vld [vmem:[%s3240_s0] sm:$0xff]  ;;  %vm146_vm1 = vcmask 326656   ;;  %vm405_vm2 = vcmask 654336  }
   0xa   :  { %v51_v10 = vld [vmem:[%s3247_s7 + $0x28] sm:$0xff]  ;;  %93 = vperm.xlu1 %2267, %v53_v8   ;;  %v2186_v13 = vld [vmem:[%s3241_s1] sm:$0xff]  ;;  %v49_v14 = vld [vmem:[%s3247_s7 + $0x18] sm:$0xff]  ;;  %vm870_vm3 = vcmask 261120   ;;  %vm1359_vm4 = vcmask 916480   ;;  %s2296_s14 = smov [#allocation2]  }
   0xb   :  { %v2185_v11 = vld [vmem:[%s3240_s0 + $0x8] sm:$0xff]  ;;  %103 = vperm.xlu0 %2266, %v55_v9   ;;  %83 = vperm.xlu2 %2268, %v51_v10   ;;  %v48_v15 = vld [vmem:[%s3247_s7 + $0x10] sm:$0xff]  ;;  %v46_v16 = vld [vmem:[%s3247_s7] sm:$0xff]  ;;  %s1811_s15 = sshll.u32 %s2296_s14, 4  ;;  %s1813_s18 = sshll.u32 %s3248_s8, 4  ;;  %s1812_s15 = int_to_ptr.vmem [resolvable:$true] %s1811_s15  ;;  %s1814_s18 = int_to_ptr.hbm [resolvable:$true] %s1813_s18 }
   0xc   :  { %172 = vmatpush.bf16.msra.mxu0 %v2185_v11  ;;  %v249_v17 = vld [vmem:[%s3247_s7 + $0xc0] sm:$0xff]  ;;  %v47_v18 = vld [vmem:[%s3247_s7 + $0x8] sm:$0xff]  ;;  %v248_v21 = vld [vmem:[%s3247_s7 + $0xb8] sm:$0xff]  ;;  %s2298_s19 = smov 8  }
   0xd   :  { %v250_v19 = vld [vmem:[%s3247_s7 + $0xc8] sm:$0xff]  ;;  %v247_v22 = vld [vmem:[%s3247_s7 + $0xb0] sm:$0xff]  ;;  %v245_v23 = vld [vmem:[%s3247_s7 + $0xa0] sm:$0xff] }
   0xe   :  { %v2187_v20 = vld [vmem:[%s3241_s1 + $0x8] sm:$0xff]  ;;  %v243_v24 = vld [vmem:[%s3247_s7 + $0x90] sm:$0xff]  ;;  %v244_v26 = vld [vmem:[%s3247_s7 + $0x98] sm:$0xff] }
   0xf   :  { %v246_v25 = vld [vmem:[%s3247_s7 + $0xa8] sm:$0xff]  ;;  %v2188_v27 = vld [vmem:[%s3241_s1 + $0x10] sm:$0xff]  ;;  %v241_v29 = vld [vmem:[%s3247_s7 + $0x80] sm:$0xff] }
  0x10   :  { %173 = vmatpush.bf16.msra.mxu0 %v2184_v12  ;;  %v242_v28 = vld [vmem:[%s3247_s7 + $0x88] sm:$0xff]  ;;  %v239_v30 = vld [vmem:[%s3247_s7 + $0x70] sm:$0xff]  ;;  %v237_v31 = vld [vmem:[%s3247_s7 + $0x60] sm:$0xff] }
  0x11   :  { %v240_v32 = vld [vmem:[%s3247_s7 + $0x78] sm:$0xff]  ;;  %v238_v33 = vld [vmem:[%s3247_s7 + $0x68] sm:$0xff]  ;;  %v253_v36 = vld [vmem:[%s3247_s7 + $0xe0] sm:$0xff] }
  0x12   :  { %73 = vperm.xlu1 %2267, %v49_v14   ;;  %v2189_v34 = vld [vmem:[%s3241_s1 + $0x18] sm:$0xff]  ;;  %v254_v35 = vld [vmem:[%s3247_s7 + $0xe8] sm:$0xff]  ;;  %v235_v37 = vld [vmem:[%s3247_s7 + $0x50] sm:$0xff] }
  0x13   :  { %1853 = vmatmul.msk.bf16.vlgmr.msra.gmra.mxu0 %vm146_vm1, %v2186_v13  ;;  %68 = vperm.xlu0 %2266, %v48_v15   ;;  %v251_v38 = vld [vmem:[%s3247_s7 + $0xd0] sm:$0xff]  ;;  %v236_v39 = vld [vmem:[%s3247_s7 + $0x58] sm:$0xff]  ;;  %v2190_v41 = vld [vmem:[%s3241_s1 + $0x20] sm:$0xff] }
  0x14   :  { %58 = vperm.xlu2 %2268, %v46_v16   ;;  %v252_v40 = vld [vmem:[%s3247_s7 + $0xd8] sm:$0xff]  ;;  %v570_v42 = vld [vmem:[%s3247_s7 + $0x168] sm:$0xff]  ;;  %v569_v43 = vld [vmem:[%s3247_s7 + $0x160] sm:$0xff] }
  0x15   :  { %v567_v44 = vld [vmem:[%s3247_s7 + $0x150] sm:$0xff]  ;;  %v568_v46 = vld [vmem:[%s3247_s7 + $0x158] sm:$0xff]  ;;  %v566_v48 = vld [vmem:[%s3247_s7 + $0x148] sm:$0xff] }
  0x16   :  { %v583_v45 = vld [vmem:[%s3247_s7 + $0x1d0] sm:$0xff]  ;;  %v584_v47 = vld [vmem:[%s3247_s7 + $0x1d8] sm:$0xff]  ;;  %v565_v49 = vld [vmem:[%s3247_s7 + $0x140] sm:$0xff] }
  0x17   :  { %v581_v50 = vld [vmem:[%s3247_s7 + $0x1c0] sm:$0xff]  ;;  %v563_v51 = vld [vmem:[%s3247_s7 + $0x130] sm:$0xff]  ;;  %v582_v52 = vld [vmem:[%s3247_s7 + $0x1c8] sm:$0xff] }
  0x18   :  { %v564_v53 = vld [vmem:[%s3247_s7 + $0x138] sm:$0xff]  ;;  %v579_v55 = vld [vmem:[%s3247_s7 + $0x1b0] sm:$0xff]  ;;  %v561_v56 = vld [vmem:[%s3247_s7 + $0x120] sm:$0xff] }
  0x19   :  { %v580_v54 = vld [vmem:[%s3247_s7 + $0x1b8] sm:$0xff]  ;;  %v577_v57 = vld [vmem:[%s3247_s7 + $0x1a0] sm:$0xff]  ;;  %v562_v58 = vld [vmem:[%s3247_s7 + $0x128] sm:$0xff] }
  0x1a   :  { %327 = vperm.xlu1 %2267, %v249_v17   ;;  %v578_v59 = vld [vmem:[%s3247_s7 + $0x1a8] sm:$0xff]  ;;  %v560_v60 = vld [vmem:[%s3247_s7 + $0x118] sm:$0xff]  ;;  %v559_v61 = vld [vmem:[%s3247_s7 + $0x110] sm:$0xff] }
  0x1b   :  { %63 = vperm.xlu0 %2266, %v47_v18   ;;  %v575_v62 = vld [vmem:[%s3247_s7 + $0x190] sm:$0xff]  ;;  %v557_v63 = vld [vmem:[%s3247_s7 + $0x100] sm:$0xff]  ;;  %v576_v0 = vld [vmem:[%s3247_s7 + $0x198] sm:$0xff] }
  0x1c   :  { %332 = vperm.xlu2 %2268, %v250_v19   ;;  %v558_v1 = vld [vmem:[%s3247_s7 + $0x108] sm:$0xff]  ;;  %v573_v4 = vld [vmem:[%s3247_s7 + $0x180] sm:$0xff]  ;;  %v555_v5 = vld [vmem:[%s3247_s7 + $0xf0] sm:$0xff] }
  0x1d   :  { %v574_v2 = vld [vmem:[%s3247_s7 + $0x188] sm:$0xff]  ;;  %v571_v6 = vld [vmem:[%s3247_s7 + $0x170] sm:$0xff]  ;;  %v556_v8 = vld [vmem:[%s3247_s7 + $0xf8] sm:$0xff] }
  0x1e   :  { %v572_v9 = vld [vmem:[%s3247_s7 + $0x178] sm:$0xff]  ;;  %v1163_v12 = vld [vmem:[%s3247_s7 + $0x250] sm:$0xff]  ;;  %v1161_v13 = vld [vmem:[%s3247_s7 + $0x240] sm:$0xff] }
  0x1f   :  { %v1164_v10 = vld [vmem:[%s3247_s7 + $0x258] sm:$0xff]  ;;  %v1159_v14 = vld [vmem:[%s3247_s7 + $0x230] sm:$0xff]  ;;  %v1162_v16 = vld [vmem:[%s3247_s7 + $0x248] sm:$0xff] }
  0x20   :  { %v1160_v17 = vld [vmem:[%s3247_s7 + $0x238] sm:$0xff]  ;;  %v1158_v18 = vld [vmem:[%s3247_s7 + $0x228] sm:$0xff] }
  0x22   :  { %322 = vperm.xlu1 %2267, %v248_v21   ;;  %v1155_v21 = vld [vmem:[%s3247_s7 + $0x210] sm:$0xff] }
  0x23   :  { %1854 = vmatmul.msk.bf16.gmra.mxu0 %vm146_vm1, %v2187_v20  ;;  %317 = vperm.xlu0 %2266, %v247_v22   ;;  %v1157_v20 = vld [vmem:[%s3247_s7 + $0x220] sm:$0xff] }
  0x24   :  { %307 = vperm.xlu2 %2268, %v245_v23   ;;  %v1153_v22 = vld [vmem:[%s3247_s7 + $0x200] sm:$0xff] }
  0x2a   :  { %297 = vperm.xlu1 %2267, %v243_v24   ;;  %v1156_v24 = vld [vmem:[%s3247_s7 + $0x218] sm:$0xff] }
  0x2b   :  { %312 = vperm.xlu0 %2266, %v246_v25   ;;  %v1154_v25 = vld [vmem:[%s3247_s7 + $0x208] sm:$0xff] }
  0x2c   :  { %302 = vperm.xlu2 %2268, %v244_v26   ;;  %v1152_v26 = vld [vmem:[%s3247_s7 + $0x1f8] sm:$0xff] }
  0x32   :  { %292 = vperm.xlu1 %2267, %v242_v28   ;;  %v1151_v28 = vld [vmem:[%s3247_s7 + $0x1f0] sm:$0xff] }
  0x33   :  { %1855 = vmatmul.msk.bf16.gmra.mxu0 %vm146_vm1, %v2188_v27  ;;  %287 = vperm.xlu0 %2266, %v241_v29   ;;  %v1149_v29 = vld [vmem:[%s3247_s7 + $0x1e0] sm:$0xff] }
  0x34   :  { %277 = vperm.xlu2 %2268, %v239_v30  }
  0x3a   :  { %267 = vperm.xlu1 %2267, %v237_v31   ;;  %v1167_v31 = vld [vmem:[%s3247_s7 + $0x270] sm:$0xff] }
  0x3b   :  { %282 = vperm.xlu0 %2266, %v240_v32  }
  0x3c   :  { %272 = vperm.xlu2 %2268, %v238_v33   ;;  %v1150_v33 = vld [vmem:[%s3247_s7 + $0x1e8] sm:$0xff] }
  0x42   :  { %352 = vperm.xlu1 %2267, %v254_v35  }
  0x43   :  { %1856 = vmatmul.msk.bf16.gmra.mxu0 %vm146_vm1, %v2189_v34  ;;  %347 = vperm.xlu0 %2266, %v253_v36   ;;  %v1168_v34 = vld [vmem:[%s3247_s7 + $0x278] sm:$0xff]  ;;  %v1166_v36 = vld [vmem:[%s3247_s7 + $0x268] sm:$0xff] }
  0x44   :  { %257 = vperm.xlu2 %2268, %v235_v37  }
  0x4a   :  { %337 = vperm.xlu1 %2267, %v251_v38  }
  0x4b   :  { %262 = vperm.xlu0 %2266, %v236_v39   ;;  %v1165_v39 = vld [vmem:[%s3247_s7 + $0x260] sm:$0xff] }
  0x4c   :  { %342 = vperm.xlu2 %2268, %v252_v40   ;;  %v1556_v40 = vld [vmem:[%s3247_s7 + $0x2c0] sm:$0xff] }
  0x52   :  { %662 = vperm.xlu1 %2267, %v570_v42  }
  0x53   :  { %1857 = vmatmul.msk.bf16.gmra.mxu0 %vm146_vm1, %v2190_v41  ;;  %657 = vperm.xlu0 %2266, %v569_v43  }
  0x54   :  { %647 = vperm.xlu2 %2268, %v567_v44   ;;  %v1554_v44 = vld [vmem:[%s3247_s7 + $0x2b0] sm:$0xff] }
  0x5a   :  { %727 = vperm.xlu1 %2267, %v583_v45  }
  0x5b   :  { %652 = vperm.xlu0 %2266, %v568_v46   ;;  %v1557_v46 = vld [vmem:[%s3247_s7 + $0x2c8] sm:$0xff] }
  0x5c   :  { %732 = vperm.xlu2 %2268, %v584_v47  }
  0x5d   :  { %v79_v41 = vpop.permute.xlu2 %78 }
  0x62   :  { %642 = vperm.xlu1 %2267, %v566_v48  }
  0x63   :  { %637 = vperm.xlu0 %2266, %v565_v49   ;;  %v1555_v49 = vld [vmem:[%s3247_s7 + $0x2b8] sm:$0xff] }
  0x64   :  { %717 = vperm.xlu2 %2268, %v581_v50  }
  0x6a   :  { %627 = vperm.xlu1 %2267, %v563_v51  }
  0x6b   :  { %722 = vperm.xlu0 %2266, %v582_v52  }
  0x6c   :  { %632 = vperm.xlu2 %2268, %v564_v53  }
  0x72   :  { %712 = vperm.xlu1 %2267, %v580_v54   ;;  %v84_v54 = vpop.permute.xlu2 %83 }
  0x73   :  { %707 = vperm.xlu0 %2266, %v579_v55  }
  0x74   :  { %617 = vperm.xlu2 %2268, %v561_v56   ;;  %v89_v35 = vpop.permute.xlu1 %88 }
  0x75   :  { %v99_v30 = vpop.permute.xlu0 %98 }
  0x7a   :  { %697 = vperm.xlu1 %2267, %v577_v57  }
  0x7b   :  { %622 = vperm.xlu0 %2266, %v562_v58  }
  0x7c   :  { %702 = vperm.xlu2 %2268, %v578_v59   ;;  %v94_v42 = vpop.permute.xlu1 %93 }
  0x7d   :  { %v104_v37 = vpop.permute.xlu0 %103 }
  0x82   :  { %612 = vperm.xlu1 %2267, %v560_v60   ;;  %v1553_v60 = vld [vmem:[%s3247_s7 + $0x2a8] sm:$0xff] }
  0x83   :  { %607 = vperm.xlu0 %2266, %v559_v61  }
  0x84   :  { %687 = vperm.xlu2 %2268, %v575_v62   ;;  %v74_v61 = vpop.permute.xlu1 %73  ;;  %v1552_v62 = vld [vmem:[%s3247_s7 + $0x2a0] sm:$0xff] }
  0x85   :  { %v69_v50 = vpop.permute.xlu0 %68 }
  0x8a   :  { %597 = vperm.xlu1 %2267, %v557_v63  }
  0x8b   :  { %692 = vperm.xlu0 %2266, %v576_v0  }
  0x8c   :  { %602 = vperm.xlu2 %2268, %v558_v1  }
  0x90   :  { %v2538_v3 = vpop.f32.mrf.mxu0 }
  0x92   :  { %682 = vperm.xlu1 %2267, %v574_v2   ;;  %v1550_v2 = vld [vmem:[%s3247_s7 + $0x290] sm:$0xff] }
  0x93   :  { %677 = vperm.xlu0 %2266, %v573_v4  }
  0x94   :  { %587 = vperm.xlu2 %2268, %v555_v5  }
  0x98   :  { %v2549_v7 = vpop.f32.mrf.mxu0 }
  0x9a   :  { %667 = vperm.xlu1 %2267, %v571_v6   ;;  %v64_v6 = vpop.permute.xlu0 %63 }
  0x9b   :  { %592 = vperm.xlu0 %2266, %v556_v8   ;;  %v178_v8 = vadd.f32 %v2549_v7, %v64_v6  ;;  %v1549_v7 = vld [vmem:[%s3247_s7 + $0x288] sm:$0xff] }
  0x9c   :  { %672 = vperm.xlu2 %2268, %v572_v9  }
  0xa0   :  { %v2560_v11 = vpop.f32.mrf.mxu0 }
  0xa1   :  { %v181_v4 = vadd.f32 %v2560_v11, %v69_v50  ;;  %v1551_v11 = vld [vmem:[%s3247_s7 + $0x298] sm:$0xff] }
  0xa2   :  { %1246 = vperm.xlu1 %2267, %v1164_v10  }
  0xa3   :  { %1241 = vperm.xlu0 %2266, %v1163_v12   ;;  %v59_v12 = vpop.permute.xlu2 %58 }
  0xa4   :  { %1231 = vperm.xlu2 %2268, %v1161_v13   ;;  %v176_v13 = vadd.f32 %v2538_v3, %v59_v12 }
  0xa8   :  { %v2571_v15 = vpop.f32.mrf.mxu0 }
  0xa9   :  { %v183_v63 = vadd.f32 %v2571_v15, %v74_v61  ;;  %v1548_v15 = vld [vmem:[%s3247_s7 + $0x280] sm:$0xff] }
  0xaa   :  { %1221 = vperm.xlu1 %2267, %v1159_v14   ;;  %v202_v14 = vmax.f32 %v181_v4, 0.0 }
  0xab   :  { %1236 = vperm.xlu0 %2266, %v1162_v16   ;;  %v203_v9 = vmax.f32 %v183_v63, 0.0  ;;  %v201_v16 = vmax.f32 %v178_v8, 0.0 }
  0xac   :  { %1226 = vperm.xlu2 %2268, %v1160_v17  }
  0xad   :  { %v211_v17 = vpack.c.bf16 %v203_v9, %v202_v14 }
  0xb0   :  { %v185_v19 = vpop.f32.mrf.mxu0 }
  0xb1   :  { %v186_v58 = vadd.f32 %v185_v19, %v79_v41  ;;  %v2191_v19 = vld [vmem:[%s3242_s2] sm:$0xff] }
  0xb2   :  { %1216 = vperm.xlu1 %2267, %v1158_v18   ;;  %v200_v18 = vmax.f32 %v176_v13, 0.0 }
  0xb3   :  { %1211 = vperm.xlu0 %2266, %v1157_v20   ;;  %v204_v5 = vmax.f32 %v186_v58, 0.0  ;;  %v1755_v20 = vld [vmem:[%s3247_s7 + $0x2d8] sm:$0xff] }
  0xb4   :  { %1201 = vperm.xlu2 %2268, %v1155_v21   ;;  %v210_v3 = vpack.c.bf16 %v201_v16, %v200_v18  ;;  %v1754_v21 = vld [vmem:[%s3247_s7 + $0x2d0] sm:$0xff] }
  0xb8   :  { %v187_v23 = vpop.f32.mrf.mxu0 }
  0xb9   :  { %v188_v55 = vadd.f32 %v187_v23, %v84_v54  ;;  %v2192_v23 = vld [vmem:[%s3242_s2 + $0x8] sm:$0xff] }
  0xba   :  { %1191 = vperm.xlu1 %2267, %v1153_v22   ;;  %v1756_v22 = vld [vmem:[%s3247_s7 + $0x2e0] sm:$0xff] }
  0xbb   :  { %1206 = vperm.xlu0 %2266, %v1156_v24   ;;  %v205_v0 = vmax.f32 %v188_v55, 0.0  ;;  %v2193_v24 = vld [vmem:[%s3242_s2 + $0x10] sm:$0xff] }
  0xbc   :  { %1196 = vperm.xlu2 %2268, %v1154_v25   ;;  %v2194_v25 = vld [vmem:[%s3242_s2 + $0x18] sm:$0xff] }
  0xbd   :  { %v212_v10 = vpack.c.bf16 %v205_v0, %v204_v5 }
  0xc0   :  { %v190_v27 = vpop.f32.mrf.mxu0 }
  0xc1   :  { %v191_v51 = vadd.f32 %v190_v27, %v89_v35  ;;  %v2196_v27 = vld [vmem:[%s3242_s2 + $0x28] sm:$0xff] }
  0xc2   :  { %1186 = vperm.xlu1 %2267, %v1152_v26   ;;  %v2195_v26 = vld [vmem:[%s3242_s2 + $0x20] sm:$0xff] }
  0xc3   :  { %1181 = vperm.xlu0 %2266, %v1151_v28   ;;  %v206_v59 = vmax.f32 %v191_v51, 0.0  ;;  %v2197_v28 = vld [vmem:[%s3242_s2 + $0x30] sm:$0xff] }
  0xc4   :  { %1171 = vperm.xlu2 %2268, %v1149_v29   ;;  %v2198_v29 = vld [vmem:[%s3242_s2 + $0x38] sm:$0xff] }
  0xc8   :  { %v192_v32 = vpop.f32.mrf.mxu0 }
  0xc9   :  { %v193_v47 = vadd.f32 %v192_v32, %v94_v42 }
  0xca   :  { %1261 = vperm.xlu1 %2267, %v1167_v31  }
  0xcb   :  { %1176 = vperm.xlu0 %2266, %v1150_v33   ;;  %v207_v56 = vmax.f32 %v193_v47, 0.0  ;;  %v2200_v33 = vld [vmem:[%s3242_s2 + $0x48] sm:$0xff] }
  0xcc   :  { %1266 = vperm.xlu2 %2268, %v1168_v34  }
  0xcd   :  { %v213_v1 = vpack.c.bf16 %v207_v56, %v206_v59 }
  0xd0   :  { %v195_v38 = vpop.f32.mrf.mxu0 }
  0xd1   :  { %v196_v43 = vadd.f32 %v195_v38, %v99_v30  ;;  %v2199_v30 = vld [vmem:[%s3242_s2 + $0x40] sm:$0xff] }
  0xd2   :  { %1256 = vperm.xlu1 %2267, %v1166_v36  }
  0xd3   :  { %1251 = vperm.xlu0 %2266, %v1165_v39   ;;  %v208_v52 = vmax.f32 %v196_v43, 0.0 }
  0xd4   :  { %1600 = vperm.xlu2 %2268, %v1556_v40  }
  0xd8   :  { %v197_v45 = vpop.f32.mrf.mxu0 }
  0xd9   :  { %v198_v48 = vadd.f32 %v197_v45, %v104_v37  ;;  %v328_v45 = vpop.permute.xlu1 %327 }
  0xda   :  { %1590 = vperm.xlu1 %2267, %v1554_v44   ;;  %v333_v44 = vpop.permute.xlu2 %332 }
  0xdb   :  { %1605 = vperm.xlu0 %2266, %v1557_v46   ;;  %v209_v53 = vmax.f32 %v198_v48, 0.0  ;;  %v318_v46 = vpop.permute.xlu0 %317 }
  0xdc   :  { %1595 = vperm.xlu2 %2268, %v1555_v49  }
  0xdd   :  { %v214_v57 = vpack.c.bf16 %v209_v53, %v208_v52 }
  0xdf   :  { %439 = vmatpush.bf16.msra.mxu1 %v214_v57 }
  0xe1   :  { %v323_v49 = vpop.permute.xlu1 %322 }
  0xe2   :  { %1585 = vperm.xlu1 %2267, %v1553_v60   ;;  %v308_v48 = vpop.permute.xlu2 %307 }
  0xe3   :  { %440 = vmatpush.bf16.msra.mxu1 %v213_v1  ;;  %1580 = vperm.xlu0 %2266, %v1552_v62   ;;  %v313_v50 = vpop.permute.xlu0 %312 }
  0xe4   :  { %1570 = vperm.xlu2 %2268, %v1550_v2  }
  0xe7   :  { %441 = vmatpush.bf16.msra.mxu1 %v212_v10 }
  0xe9   :  { %v298_v54 = vpop.permute.xlu1 %297 }
  0xea   :  { %1560 = vperm.xlu1 %2267, %v1548_v15   ;;  %v303_v52 = vpop.permute.xlu2 %302 }
  0xeb   :  { %442 = vmatpush.bf16.msra.mxu1 %v211_v17  ;;  %1575 = vperm.xlu0 %2266, %v1551_v11   ;;  %v288_v55 = vpop.permute.xlu0 %287 }
  0xec   :  { %1565 = vperm.xlu2 %2268, %v1549_v7  }
  0xef   :  { %443 = vmatpush.bf16.msra.mxu1 %v210_v3 }
  0xf1   :  { %v293_v61 = vpop.permute.xlu1 %292 }
  0xf2   :  { %1898 = vmatmul.msk.bf16.vlgmr.msra.gmra.mxu1 %vm405_vm2, %v2191_v19  ;;  %1764 = vperm.xlu1 %2267, %v1755_v20   ;;  %v278_v60 = vpop.permute.xlu2 %277 }
  0xf3   :  { %1759 = vperm.xlu0 %2266, %v1754_v21   ;;  %v283_v1 = vpop.permute.xlu0 %282 }
  0xf4   :  { %1769 = vperm.xlu2 %2268, %v1756_v22  }
  0xf9   :  { %v268_v16 = vpop.permute.xlu1 %267 }
  0xfa   :  { %v273_v11 = vpop.permute.xlu2 %272 }
  0xfb   :  { %v348_v3 = vpop.permute.xlu0 %347 }
 0x102   :  { %1899 = vmatmul.msk.bf16.gmra.mxu1 %vm405_vm2, %v2192_v23 }
 0x112   :  { %1900 = vmatmul.msk.bf16.gmra.mxu1 %vm405_vm2, %v2193_v24 }
 0x122   :  { %1901 = vmatmul.msk.bf16.gmra.mxu1 %vm405_vm2, %v2194_v25 }
 0x132   :  { %1902 = vmatmul.msk.bf16.gmra.mxu1 %vm405_vm2, %v2195_v26 }
 0x142   :  { %1903 = vmatmul.msk.bf16.gmra.mxu1 %vm405_vm2, %v2196_v27 }
 0x152   :  { %1904 = vmatmul.msk.bf16.gmra.mxu1 %vm405_vm2, %v2197_v28 }
 0x162   :  { %1905 = vmatmul.msk.bf16.gmra.mxu1 %vm405_vm2, %v2198_v29 }
 0x16f   :  { %v2699_v31 = vpop.f32.mrf.mxu1 }
 0x172   :  { %1906 = vmatmul.msk.bf16.gmra.mxu1 %vm405_vm2, %v2199_v30  ;;  %v258_v30 = vpop.permute.xlu2 %257 }
 0x177   :  { %v2702_v32 = vpop.f32.mrf.mxu1 }
 0x17f   :  { %v2707_v34 = vpop.f32.mrf.mxu1 }
 0x182   :  { %1907 = vmatmul.msk.bf16.gmra.mxu1 %vm405_vm2, %v2200_v33  ;;  %v353_v33 = vpop.permute.xlu1 %352 }
 0x187   :  { %v452_v35 = vpop.f32.mrf.mxu1 }
 0x188   :  { %v453_v27 = vadd.f32 %v452_v35, %v273_v11  ;;  %v2208_v11 = vld [vmem:[%s3243_s3 + $0x34] sm:$0xf0] }
 0x18f   :  { %v455_v36 = vpop.f32.mrf.mxu1 }
 0x190   :  { %v456_v25 = vadd.f32 %v455_v36, %v278_v60  ;;  %v2201_v60 = vld [vmem:[%s3243_s3 + $0x4] sm:$0xf] }
 0x197   :  { %v457_v37 = vpop.f32.mrf.mxu1 }
 0x198   :  { %v458_v22 = vadd.f32 %v457_v37, %v283_v1  ;;  %v2204_v1 = vld [vmem:[%s3243_s3 + $0x14] sm:$0xf0] }
 0x19a   :  { %v500_v28 = vmax.f32 %v458_v22, 0.0 }
 0x19f   :  { %v460_v38 = vpop.f32.mrf.mxu1 }
 0x1a0   :  { %v461_v19 = vadd.f32 %v460_v38, %v288_v55 }
 0x1a2   :  { %v501_v26 = vmax.f32 %v461_v19, 0.0 }
 0x1a7   :  { %v462_v39 = vpop.f32.mrf.mxu1 }
 0x1a8   :  { %v463_v17 = vadd.f32 %v462_v39, %v293_v61  ;;  %v451_v39 = vadd.f32 %v2707_v34, %v268_v16  ;;  %v1910_v34 = vld [vmem:[%s3243_s3] sm:$0xf]  ;;  %v1912_v61 = vld [vmem:[%s3243_s3 + $0x8] sm:$0xf0] }
 0x1aa   :  { %v502_v23 = vmax.f32 %v463_v17, 0.0  ;;  %v497_v36 = vmax.f32 %v451_v39, 0.0  ;;  %v2207_v17 = vld [vmem:[%s3243_s3 + $0x34] sm:$0xf] }
 0x1ac   :  { %v518_v29 = vpack.c.bf16 %v502_v23, %v501_v26 }
 0x1af   :  { %v465_v40 = vpop.f32.mrf.mxu1 }
 0x1b0   :  { %v466_v14 = vadd.f32 %v465_v40, %v298_v54  ;;  %v499_v40 = vmax.f32 %v456_v25, 0.0  ;;  %v1944_v25 = vld [vmem:[%s3243_s3 + $0x48] sm:$0xf0] }
 0x1b2   :  { %v503_v20 = vmax.f32 %v466_v14, 0.0  ;;  %v517_v37 = vpack.c.bf16 %v500_v28, %v499_v40  ;;  %v1950_v28 = vld [vmem:[%s3243_s3 + $0x50] sm:$0xf]  ;;  %v2211_v40 = vld [vmem:[%s3243_s3 + $0x54] sm:$0xf] }
 0x1b7   :  { %v467_v41 = vpop.f32.mrf.mxu1 }
 0x1b8   :  { %v468_v10 = vadd.f32 %v467_v41, %v303_v52  ;;  %v263_v41 = vpop.permute.xlu0 %262  ;;  %v338_v52 = vpop.permute.xlu1 %337 }
 0x1ba   :  { %v504_v7 = vmax.f32 %v468_v10, 0.0 }
 0x1bc   :  { %v519_v24 = vpack.c.bf16 %v504_v7, %v503_v20  ;;  %v1936_v7 = vld [vmem:[%s3243_s3 + $0x38] sm:$0xf0]  ;;  %v1942_v20 = vld [vmem:[%s3243_s3 + $0x40] sm:$0xf] }
 0x1bf   :  { %v470_v42 = vpop.f32.mrf.mxu1 }
 0x1c0   :  { %v471_v6 = vadd.f32 %v470_v42, %v308_v48  ;;  %v448_v42 = vadd.f32 %v2702_v32, %v263_v41  ;;  %v2202_v48 = vld [vmem:[%s3243_s3 + $0x4] sm:$0xf0]  ;;  %v343_v32 = vpop.permute.xlu2 %342  ;;  %v1952_v41 = vld [vmem:[%s3243_s3 + $0x58] sm:$0xf0] }
 0x1c2   :  { %v505_v15 = vmax.f32 %v471_v6, 0.0 }
 0x1c7   :  { %v472_v43 = vpop.f32.mrf.mxu1 }
 0x1c8   :  { %v473_v2 = vadd.f32 %v472_v43, %v313_v50  ;;  %v498_v43 = vmax.f32 %v453_v27, 0.0  ;;  %v2767_v19 = vpop.permute.xlu2 %647 }
 0x1ca   :  { %v506_v12 = vmax.f32 %v473_v2, 0.0  ;;  %v516_v35 = vpack.c.bf16 %v498_v43, %v497_v36  ;;  %v2214_v36 = vld [vmem:[%s3243_s3 + $0x64] sm:$0xf0] }
 0x1cc   :  { %v520_v18 = vpack.c.bf16 %v506_v12, %v505_v15  ;;  %v2205_v12 = vld [vmem:[%s3243_s3 + $0x24] sm:$0xf]  ;;  %v1934_v15 = vld [vmem:[%s3243_s3 + $0x30] sm:$0xf] }
 0x1cd   :  { %v1935_v16 = vor.u32 %v2208_v11, %v1934_v15 }
 0x1cf   :  { %v475_v47 = vpop.f32.mrf.mxu1 }
 0x1d0   :  { %v476_v62 = vadd.f32 %v475_v47, %v318_v46  ;;  %v2783_v26 = vpop.permute.xlu2 %732 }
 0x1d2   :  { %v507_v8 = vmax.f32 %v476_v62, 0.0 }
 0x1d7   :  { %v477_v51 = vpop.f32.mrf.mxu1 }
 0x1d8   :  { %v478_v58 = vadd.f32 %v477_v51, %v323_v49  ;;  %v2794_v39 = vpop.permute.xlu2 %717 }
 0x1da   :  { %v508_v4 = vmax.f32 %v478_v58, 0.0 }
 0x1dc   :  { %v521_v13 = vpack.c.bf16 %v508_v4, %v507_v8  ;;  %v2203_v4 = vld [vmem:[%s3243_s3 + $0x14] sm:$0xf]  ;;  %v1926_v8 = vld [vmem:[%s3243_s3 + $0x20] sm:$0xf] }
 0x1df   :  { %v480_v53 = vpop.f32.mrf.mxu1 }
 0x1e0   :  { %v481_v56 = vadd.f32 %v480_v53, %v328_v45  ;;  %v496_v45 = vmax.f32 %v448_v42, 0.0  ;;  %v1911_v53 = vor.u32 %v2202_v48, %v1910_v34  ;;  %v1955_v42 = vor.u32 %v2211_v40, %v1952_v41  ;;  %v2213_v34 = vld [vmem:[%s3243_s3 + $0x64] sm:$0xf]  ;;  %v1960_v48 = vld [vmem:[%s3243_s3 + $0x68] sm:$0xf0] }
 0x1e2   :  { %v509_v63 = vmax.f32 %v481_v56, 0.0 }
 0x1e7   :  { %v482_v57 = vpop.f32.mrf.mxu1 }
 0x1e8   :  { %v483_v59 = vadd.f32 %v482_v57, %v333_v44  ;;  %v446_v44 = vadd.f32 %v2699_v31, %v258_v30 }
 0x1ea   :  { %v510_v0 = vmax.f32 %v483_v59, 0.0  ;;  %v495_v46 = vmax.f32 %v446_v44, 0.0  ;;  %v1958_v44 = vld [vmem:[%s3243_s3 + $0x60] sm:$0xf] }
 0x1ec   :  { %v522_v5 = vpack.c.bf16 %v510_v0, %v509_v63  ;;  %v515_v31 = vpack.c.bf16 %v496_v45, %v495_v46  ;;  %v1915_v63 = vor.u32 %v2201_v60, %v1912_v61  ;;  %v1918_v0 = vld [vmem:[%s3243_s3 + $0x10] sm:$0xf]  ;;  %v1959_v45 = vor.u32 %v2214_v36, %v1958_v44  ;;  %v1974_v60 = vld [vmem:[%s3243_s3 + $0x80] sm:$0xf]  ;;  %v2218_v61 = vld [vmem:[%s3243_s3 + $0x84] sm:$0xf0] }
 0x1ed   :  { %v1919_v2 = vor.u32 %v2204_v1, %v1918_v0  ;;  %v2222_v44 = vld [vmem:[%s3243_s3 + $0xa4] sm:$0xf0] }
 0x1ee   :  { %916 = vmatpush.bf16.msra.mxu2 %v522_v5  ;;  %v1920_v5 = vld [vmem:[%s3243_s3 + $0x18] sm:$0xf0] }
 0x1ef   :  { %v485_v9 = vpop.f32.mrf.mxu1  ;;  %v1923_v6 = vor.u32 %v2203_v4, %v1920_v5  ;;  %v1976_v4 = vld [vmem:[%s3243_s3 + $0x88] sm:$0xf0] }
 0x1f0   :  { %v486_v54 = vadd.f32 %v485_v9, %v338_v52  ;;  %v2206_v9 = vld [vmem:[%s3243_s3 + $0x24] sm:$0xf0] }
 0x1f1   :  { %v1927_v10 = vor.u32 %v2206_v9, %v1926_v8 }
 0x1f2   :  { %917 = vmatpush.bf16.msra.mxu2 %v521_v13  ;;  %v511_v59 = vmax.f32 %v486_v54, 0.0  ;;  %v1928_v13 = vld [vmem:[%s3243_s3 + $0x28] sm:$0xf0] }
 0x1f3   :  { %v1931_v14 = vor.u32 %v2205_v12, %v1928_v13  ;;  %v1982_v12 = vld [vmem:[%s3243_s3 + $0x90] sm:$0xf]  ;;  %v2220_v13 = vld [vmem:[%s3243_s3 + $0x94] sm:$0xf0] }
 0x1f6   :  { %918 = vmatpush.bf16.msra.mxu2 %v520_v18  ;;  %v1939_v18 = vor.u32 %v2207_v17, %v1936_v7  ;;  %v1983_v17 = vor.u32 %v2220_v13, %v1982_v12 }
 0x1f7   :  { %v487_v21 = vpop.f32.mrf.mxu1 }
 0x1f8   :  { %v488_v50 = vadd.f32 %v487_v21, %v343_v32  ;;  %v2210_v21 = vld [vmem:[%s3243_s3 + $0x44] sm:$0xf0]  ;;  %v1963_v32 = vor.u32 %v2213_v34, %v1960_v48 }
 0x1f9   :  { %v1943_v22 = vor.u32 %v2210_v21, %v1942_v20  ;;  %v2219_v20 = vld [vmem:[%s3243_s3 + $0x94] sm:$0xf]  ;;  %v1984_v21 = vld [vmem:[%s3243_s3 + $0x98] sm:$0xf0] }
 0x1fa   :  { %919 = vmatpush.bf16.msra.mxu2 %v519_v24  ;;  %v512_v57 = vmax.f32 %v488_v50, 0.0  ;;  %v2209_v24 = vld [vmem:[%s3243_s3 + $0x44] sm:$0xf] }
 0x1fb   :  { %v1947_v27 = vor.u32 %v2209_v24, %v1944_v25 }
 0x1fc   :  { %v523_v62 = vpack.c.bf16 %v512_v57, %v511_v59 }
 0x1fe   :  { %920 = vmatpush.bf16.msra.mxu2 %v518_v29  ;;  %v2212_v29 = vld [vmem:[%s3243_s3 + $0x54] sm:$0xf0] }
 0x1ff   :  { %v490_v38 = vpop.f32.mrf.mxu1 }
 0x200   :  { %v491_v47 = vadd.f32 %v490_v38, %v348_v3  ;;  %v2764_v3 = vpop.permute.xlu0 %657  ;;  %v2802_v38 = vpop.permute.xlu1 %662 }
 0x202   :  { %921 = vmatpush.bf16.msra.mxu2 %v517_v37  ;;  %v513_v55 = vmax.f32 %v491_v47, 0.0  ;;  %v2806_v37 = vpop.permute.xlu2 %632 }
 0x206   :  { %922 = vmatpush.bf16.msra.mxu2 %v516_v35 }
 0x207   :  { %v492_v49 = vpop.f32.mrf.mxu1 }
 0x208   :  { %v493_v51 = vadd.f32 %v492_v49, %v353_v33  ;;  %v2775_v23 = vpop.permute.xlu0 %652  ;;  %v1951_v33 = vor.u32 %v2212_v29, %v1950_v28  ;;  %v2815_v35 = vpop.permute.xlu1 %727  ;;  %v1987_v28 = vor.u32 %v2219_v20, %v1984_v21 }
 0x20a   :  { %v514_v56 = vmax.f32 %v493_v51, 0.0  ;;  %923 = vmatpush.bf16.msra.mxu2 %v515_v31  ;;  %v2819_v47 = vpop.permute.xlu2 %617  ;;  %v1966_v51 = vld [vmem:[%s3243_s3 + $0x70] sm:$0xf]  ;;  %v2216_v31 = vld [vmem:[%s3243_s3 + $0x74] sm:$0xf0] }
 0x20c   :  { %v524_v58 = vpack.c.bf16 %v514_v56, %v513_v55  ;;  %v2215_v55 = vld [vmem:[%s3243_s3 + $0x74] sm:$0xf]  ;;  %v1968_v56 = vld [vmem:[%s3243_s3 + $0x78] sm:$0xf0] }
 0x20d   :  { %924 = vmatmul.bf16.vlgmr.msra.gmra.mxu2 %v1911_v53  ;;  %v1967_v53 = vor.u32 %v2216_v31, %v1966_v51  ;;  %v2221_v51 = vld [vmem:[%s3243_s3 + $0xa4] sm:$0xf]  ;;  %v1992_v31 = vld [vmem:[%s3243_s3 + $0xa8] sm:$0xf0] }
 0x20e   :  { %1006 = vmatpush.bf16.msra.mxu3 %v524_v58  ;;  %v1971_v58 = vor.u32 %v2215_v55, %v1968_v56 }
 0x210   :  { %v2792_v30 = vpop.permute.xlu0 %637  ;;  %v2827_v49 = vpop.permute.xlu1 %642 }
 0x212   :  { %1007 = vmatpush.bf16.msra.mxu3 %v523_v62  ;;  %v2838_v52 = vpop.permute.xlu2 %702 }
 0x215   :  { %2028 = vmatmul.msk.bf16.vlgmr.msra.gmra.mxu3 %vm870_vm3, %v1915_v63  ;;  %v1975_v63 = vor.u32 %v2218_v61, %v1974_v60  ;;  %v1995_v60 = vor.u32 %v2221_v51, %v1992_v31 }
 0x218   :  { %v2804_v43 = vpop.permute.xlu0 %722  ;;  %v2840_v54 = vpop.permute.xlu1 %627 }
 0x21a   :  { %v2848_v59 = vpop.permute.xlu2 %687 }
 0x21d   :  { %929 = vmatmul.bf16.gmra.mxu2 %v1919_v2  ;;  %v2217_v2 = vld [vmem:[%s3243_s3 + $0x84] sm:$0xf] }
 0x220   :  { %v2817_v46 = vpop.permute.xlu0 %707  ;;  %v2857_v62 = vpop.permute.xlu1 %712 }
 0x222   :  { %v603_v1 = vpop.permute.xlu2 %602 }
 0x225   :  { %2029 = vmatmul.msk.bf16.gmra.mxu3 %vm870_vm3, %v1923_v6  ;;  %v1979_v6 = vor.u32 %v2217_v2, %v1976_v4  ;;  %v1998_v4 = vld [vmem:[%s3243_s3 + $0xb0] sm:$0xf] }
 0x228   :  { %v2830_v50 = vpop.permute.xlu0 %622  ;;  %v2867_v8 = vpop.permute.xlu1 %697 }
 0x22d   :  { %934 = vmatmul.bf16.gmra.mxu2 %v1927_v10  ;;  %v588_v10 = vpop.permute.xlu2 %587 }
 0x230   :  { %v608_v57 = vpop.permute.xlu0 %607  ;;  %v613_v7 = vpop.permute.xlu1 %612 }
 0x235   :  { %2030 = vmatmul.msk.bf16.gmra.mxu3 %vm870_vm3, %v1931_v14 }
 0x238   :  { %v2859_v0 = vpop.permute.xlu0 %692  ;;  %v598_v41 = vpop.permute.xlu1 %597 }
 0x23d   :  { %939 = vmatmul.bf16.gmra.mxu2 %v1935_v16 }
 0x240   :  { %v2869_v9 = vpop.permute.xlu0 %677 }
 0x245   :  { %2031 = vmatmul.msk.bf16.gmra.mxu3 %vm870_vm3, %v1939_v18 }
 0x248   :  { %v593_v18 = vpop.permute.xlu0 %592 }
 0x24d   :  { %944 = vmatmul.bf16.gmra.mxu2 %v1943_v22 }
 0x255   :  { %2032 = vmatmul.msk.bf16.gmra.mxu3 %vm870_vm3, %v1947_v27 }
 0x25d   :  { %949 = vmatmul.bf16.gmra.mxu2 %v1951_v33 }
 0x265   :  { %2033 = vmatmul.msk.bf16.gmra.mxu3 %vm870_vm3, %v1955_v42  ;;  %v1990_v42 = vld [vmem:[%s3243_s3 + $0xa0] sm:$0xf] }
 0x26d   :  { %954 = vmatmul.bf16.gmra.mxu2 %v1959_v45 }
 0x275   :  { %2034 = vmatmul.msk.bf16.gmra.mxu3 %vm870_vm3, %v1963_v32  ;;  %v1991_v32 = vor.u32 %v2222_v44, %v1990_v42  ;;  %v2008_v42 = vld [vmem:[%s3243_s3 + $0xc8] sm:$0xf0] }
 0x27d   :  { %959 = vmatmul.bf16.gmra.mxu2 %v1967_v53 }
 0x285   :  { %2035 = vmatmul.msk.bf16.gmra.mxu3 %vm870_vm3, %v1971_v58 }
 0x28d   :  { %964 = vmatmul.bf16.gmra.mxu2 %v1975_v63 }
 0x290   :  { %v925_v5 = vpop.f32.mrf.mxu2 }
 0x291   :  { %v926_v14 = vadd.f32 %v925_v5, %v588_v10  ;;  %v2224_v5 = vld [vmem:[%s3243_s3 + $0xb4] sm:$0xf0] }
 0x292   :  { %v1999_v13 = vor.u32 %v2224_v5, %v1998_v4 }
 0x295   :  { %2036 = vmatmul.msk.bf16.gmra.mxu3 %vm870_vm3, %v1979_v6 }
 0x298   :  { %v927_v15 = vpop.f32.mrf.mxu2  ;;  %v1009_v11 = vpop.f32.mrf.mxu3 }
 0x299   :  { %v1010_v16 = vadd.f32 %v1009_v11, %v926_v14  ;;  %v928_v22 = vadd.f32 %v927_v15, %v593_v18  ;;  %v2223_v14 = vld [vmem:[%s3243_s3 + $0xb4] sm:$0xf]  ;;  %v2000_v15 = vld [vmem:[%s3243_s3 + $0xb8] sm:$0xf0] }
 0x29a   :  { %v2003_v20 = vor.u32 %v2223_v14, %v2000_v15 }
 0x29b   :  { %v1084_v29 = vmax.f32 %v1010_v16, 0.0 }
 0x29d   :  { %969 = vmatmul.bf16.gmra.mxu2 %v1983_v17 }
 0x2a0   :  { %v930_v24 = vpop.f32.mrf.mxu2  ;;  %v1011_v25 = vpop.f32.mrf.mxu3 }
 0x2a1   :  { %v1012_v27 = vadd.f32 %v1011_v25, %v928_v22  ;;  %v931_v36 = vadd.f32 %v930_v24, %v598_v41  ;;  %v2006_v24 = vld [vmem:[%s3243_s3 + $0xc0] sm:$0xf]  ;;  %v2226_v25 = vld [vmem:[%s3243_s3 + $0xc4] sm:$0xf0]  ;;  %v2225_v41 = vld [vmem:[%s3243_s3 + $0xc4] sm:$0xf] }
 0x2a3   :  { %v1085_v33 = vmax.f32 %v1012_v27, 0.0 }
 0x2a5   :  { %2037 = vmatmul.msk.bf16.gmra.mxu3 %vm870_vm3, %v1987_v28  ;;  %v2885_v40 = vpack.c.bf16 %v1085_v33, %v1084_v29  ;;  %v2007_v33 = vor.u32 %v2226_v25, %v2006_v24 }
 0x2a8   :  { %v932_v45 = vpop.f32.mrf.mxu2  ;;  %v1014_v34 = vpop.f32.mrf.mxu3 }
 0x2a9   :  { %v1015_v48 = vadd.f32 %v1014_v34, %v931_v36  ;;  %v933_v53 = vadd.f32 %v932_v45, %v603_v1  ;;  %v2011_v45 = vor.u32 %v2225_v41, %v2008_v42  ;;  %v2228_v34 = vld [vmem:[%s3243_s3 + $0xd4] sm:$0xf0] }
 0x2ab   :  { %v1086_v61 = vmax.f32 %v1015_v48, 0.0 }
 0x2ad   :  { %974 = vmatmul.bf16.gmra.mxu2 %v1991_v32 }
 0x2b0   :  { %v935_v55 = vpop.f32.mrf.mxu2  ;;  %v1016_v56 = vpop.f32.mrf.mxu3 }
 0x2b1   :  { %v1017_v58 = vadd.f32 %v1016_v56, %v933_v53  ;;  %v936_v6 = vadd.f32 %v935_v55, %v608_v57  ;;  %v2227_v55 = vld [vmem:[%s3243_s3 + $0xd4] sm:$0xf]  ;;  %v2016_v56 = vld [vmem:[%s3243_s3 + $0xd8] sm:$0xf0] }
 0x2b3   :  { %v1087_v63 = vmax.f32 %v1017_v58, 0.0 }
 0x2b5   :  { %2038 = vmatmul.msk.bf16.gmra.mxu3 %vm870_vm3, %v1995_v60  ;;  %v2900_v2 = vpack.c.bf16 %v1087_v63, %v1086_v61  ;;  %v2019_v61 = vor.u32 %v2227_v55, %v2016_v56  ;;  %v2230_v63 = vld [vmem:[%s3243_s3 + $0xe4] sm:$0xf0] }
 0x2b8   :  { %v937_v1 = vpop.f32.mrf.mxu2  ;;  %v1019_v10 = vpop.f32.mrf.mxu3 }
 0x2b9   :  { %v1020_v12 = vadd.f32 %v1019_v10, %v936_v6  ;;  %v938_v11 = vadd.f32 %v937_v1, %v613_v7  ;;  %v2229_v1 = vld [vmem:[%s3243_s3 + $0xe4] sm:$0xf]  ;;  %v2024_v10 = vld [vmem:[%s3243_s3 + $0xe8] sm:$0xf0] }
 0x2ba   :  { %v2027_v14 = vor.u32 %v2229_v1, %v2024_v10 }
 0x2bb   :  { %v1088_v21 = vmax.f32 %v1020_v12, 0.0 }
 0x2bd   :  { %979 = vmatmul.bf16.gmra.mxu2 %v1999_v13 }
 0x2c0   :  { %v940_v16 = vpop.f32.mrf.mxu2  ;;  %v1021_v17 = vpop.f32.mrf.mxu3 }
 0x2c1   :  { %v1022_v18 = vadd.f32 %v1021_v17, %v938_v11  ;;  %v941_v7 = vadd.f32 %v940_v16, %v2819_v47  ;;  %v2014_v47 = vld [vmem:[%s3243_s3 + $0xd0] sm:$0xf] }
 0x2c2   :  { %v2015_v53 = vor.u32 %v2228_v34, %v2014_v47 }
 0x2c3   :  { %v1089_v57 = vmax.f32 %v1022_v18, 0.0 }
 0x2c5   :  { %2039 = vmatmul.msk.bf16.gmra.mxu3 %vm870_vm3, %v2003_v20  ;;  %v2915_v22 = vpack.c.bf16 %v1089_v57, %v1088_v21  ;;  %v683_v21 = vpop.permute.xlu1 %682 }
 0x2c8   :  { %v2924_v27 = vpop.f32.mrf.mxu2  ;;  %v1024_v28 = vpop.f32.mrf.mxu3 }
 0x2c9   :  { %v2926_v29 = vadd.f32 %v1024_v28, %v941_v7  ;;  %v943_v10 = vadd.f32 %v2924_v27, %v2830_v50 }
 0x2cd   :  { %984 = vmatmul.bf16.gmra.mxu2 %v2007_v33 }
 0x2d0   :  { %v945_v44 = vpop.f32.mrf.mxu2  ;;  %v2934_v36 = vpop.f32.mrf.mxu3 }
 0x2d1   :  { %v946_v48 = vadd.f32 %v945_v44, %v2840_v54  ;;  %v2022_v54 = vld [vmem:[%s3243_s3 + $0xe0] sm:$0xf] }
 0x2d2   :  { %v2023_v6 = vor.u32 %v2230_v63, %v2022_v54 }
 0x2d5   :  { %2040 = vmatmul.msk.bf16.gmra.mxu3 %vm870_vm3, %v2011_v45 }
 0x2d8   :  { %v947_v32 = vpop.f32.mrf.mxu2  ;;  %v1029_v51 = vpop.f32.mrf.mxu3 }
 0x2d9   :  { %v2944_v31 = vadd.f32 %v1029_v51, %v946_v48 }
 0x2dd   :  { %989 = vmatmul.bf16.gmra.mxu2 %v2015_v53 }
 0x2e0   :  { %v950_v58 = vpop.f32.mrf.mxu2  ;;  %v1031_v60 = vpop.f32.mrf.mxu3 }
 0x2e1   :  { %v951_v51 = vadd.f32 %v950_v58, %v2792_v30  ;;  %v1027_v58 = vadd.f32 %v2934_v36, %v943_v10 }
 0x2e5   :  { %2041 = vmatmul.msk.bf16.gmra.mxu3 %vm870_vm3, %v2019_v61 }
 0x2e8   :  { %v952_v4 = vpop.f32.mrf.mxu2  ;;  %v1034_v5 = vpop.f32.mrf.mxu3 }
 0x2e9   :  { %v953_v45 = vadd.f32 %v952_v4, %v2827_v49  ;;  %v1035_v56 = vadd.f32 %v1034_v5, %v951_v51  ;;  %v2234_v51 = vld [vmem:[%s3244_s4 + $0x14] sm:$0xf0] }
 0x2eb   :  { %v1094_v30 = vmax.f32 %v1035_v56, 0.0 }
 0x2ed   :  { %994 = vmatmul.bf16.gmra.mxu2 %v2023_v6 }
 0x2f0   :  { %v955_v12 = vpop.f32.mrf.mxu2  ;;  %v1036_v13 = vpop.f32.mrf.mxu3 }
 0x2f1   :  { %v956_v41 = vadd.f32 %v955_v12, %v2767_v19  ;;  %v1037_v53 = vadd.f32 %v1036_v13, %v953_v45 }
 0x2f3   :  { %v1095_v1 = vmax.f32 %v1037_v53, 0.0 }
 0x2f5   :  { %2042 = vmatmul.msk.bf16.gmra.mxu3 %vm870_vm3, %v2027_v14  ;;  %v1119_v13 = vpack.c.bf16 %v1095_v1, %v1094_v30  ;;  %v2238_v30 = vld [vmem:[%s3244_s4 + $0x34] sm:$0xf0] }
 0x2f8   :  { %v957_v15 = vpop.f32.mrf.mxu2  ;;  %v1039_v11 = vpop.f32.mrf.mxu3 }
 0x2f9   :  { %v958_v24 = vadd.f32 %v957_v15, %v2775_v23  ;;  %v1040_v47 = vadd.f32 %v1039_v11, %v956_v41  ;;  %v668_v23 = vpop.permute.xlu1 %667 }
 0x2fb   :  { %v1096_v61 = vmax.f32 %v1040_v47, 0.0 }
 0x300   :  { %v960_v16 = vpop.f32.mrf.mxu2  ;;  %v1041_v17 = vpop.f32.mrf.mxu3 }
 0x301   :  { %v961_v57 = vadd.f32 %v960_v16, %v2764_v3  ;;  %v1042_v42 = vadd.f32 %v1041_v17, %v958_v24  ;;  %v1090_v17 = vmax.f32 %v2926_v29, 0.0  ;;  %v2045_v29 = vld [vmem:[%s3244_s4] sm:$0xf] }
 0x303   :  { %v1097_v3 = vmax.f32 %v1042_v42, 0.0 }
 0x305   :  { %v1120_v4 = vpack.c.bf16 %v1097_v3, %v1096_v61 }
 0x308   :  { %v962_v18 = vpop.f32.mrf.mxu2  ;;  %v1044_v20 = vpop.f32.mrf.mxu3 }
 0x309   :  { %v963_v25 = vadd.f32 %v962_v18, %v2802_v38  ;;  %v1045_v7 = vadd.f32 %v1044_v20, %v961_v57  ;;  %v948_v38 = vadd.f32 %v947_v32, %v2806_v37  ;;  %v673_v37 = vpop.permute.xlu2 %672  ;;  %v1092_v32 = vmax.f32 %v2944_v31, 0.0 }
 0x30b   :  { %v1098_v34 = vmax.f32 %v1045_v7, 0.0  ;;  %v1032_v6 = vadd.f32 %v1031_v60, %v948_v38  ;;  %v1091_v60 = vmax.f32 %v1027_v58, 0.0  ;;  %v2232_v7 = vld [vmem:[%s3244_s4 + $0x4] sm:$0xf0] }
 0x30c   :  { %v2046_v41 = vor.u32 %v2232_v7, %v2045_v29 }
 0x30d   :  { %v1093_v12 = vmax.f32 %v1032_v6, 0.0  ;;  %v1117_v27 = vpack.c.bf16 %v1091_v60, %v1090_v17 }
 0x30f   :  { %v1118_v16 = vpack.c.bf16 %v1093_v12, %v1092_v32 }
 0x310   :  { %v965_v28 = vpop.f32.mrf.mxu2  ;;  %v1046_v33 = vpop.f32.mrf.mxu3 }
 0x311   :  { %v1047_v44 = vadd.f32 %v1046_v33, %v963_v25  ;;  %v966_v54 = vadd.f32 %v965_v28, %v668_v23 }
 0x313   :  { %v1099_v48 = vmax.f32 %v1047_v44, 0.0 }
 0x315   :  { %v1121_v55 = vpack.c.bf16 %v1099_v48, %v1098_v34  ;;  %v2053_v48 = vld [vmem:[%s3244_s4 + $0x10] sm:$0xf] }
 0x317   :  { %1390 = vmatpush.bf16.msrb.mxu0 %v1121_v55  ;;  %v2054_v55 = vor.u32 %v2234_v51, %v2053_v48 }
 0x318   :  { %v967_v19 = vpop.f32.mrf.mxu2  ;;  %v1049_v63 = vpop.f32.mrf.mxu3 }
 0x319   :  { %v1050_v49 = vadd.f32 %v1049_v63, %v966_v54  ;;  %v968_v5 = vadd.f32 %v967_v19, %v673_v37  ;;  %v2061_v19 = vld [vmem:[%s3244_s4 + $0x20] sm:$0xf]  ;;  %v2236_v63 = vld [vmem:[%s3244_s4 + $0x24] sm:$0xf0] }
 0x31b   :  { %1391 = vmatpush.bf16.msrb.mxu0 %v1120_v4  ;;  %v1100_v18 = vmax.f32 %v1050_v49, 0.0  ;;  %v2062_v49 = vor.u32 %v2236_v63, %v2061_v19  ;;  %v2248_v19 = vld [vmem:[%s3244_s4 + $0x84] sm:$0xf0] }
 0x31f   :  { %1392 = vmatpush.bf16.msrb.mxu0 %v1119_v13 }
 0x320   :  { %v970_v14 = vpop.f32.mrf.mxu2  ;;  %v1051_v15 = vpop.f32.mrf.mxu3 }
 0x321   :  { %v1052_v11 = vadd.f32 %v1051_v15, %v968_v5  ;;  %v971_v36 = vadd.f32 %v970_v14, %v2869_v9  ;;  %v2077_v5 = vld [vmem:[%s3244_s4 + $0x40] sm:$0xf]  ;;  %v2240_v14 = vld [vmem:[%s3244_s4 + $0x44] sm:$0xf0] }
 0x323   :  { %v1101_v50 = vmax.f32 %v1052_v11, 0.0  ;;  %1393 = vmatpush.bf16.msrb.mxu0 %v1118_v16  ;;  %v2078_v11 = vor.u32 %v2240_v14, %v2077_v5  ;;  %v2241_v5 = vld [vmem:[%s3244_s4 + $0x54] sm:$0xf]  ;;  %v2087_v14 = vld [vmem:[%s3244_s4 + $0x58] sm:$0xf0] }
 0x325   :  { %v2978_v20 = vpack.c.bf16 %v1101_v50, %v1100_v18 }
 0x327   :  { %1394 = vmatpush.bf16.msrb.mxu0 %v1117_v27 }
 0x328   :  { %v972_v57 = vpop.f32.mrf.mxu2  ;;  %v1054_v31 = vpop.f32.mrf.mxu3 }
 0x329   :  { %v1055_v24 = vadd.f32 %v1054_v31, %v971_v36  ;;  %v973_v25 = vadd.f32 %v972_v57, %v683_v21  ;;  %v2085_v57 = vld [vmem:[%s3244_s4 + $0x50] sm:$0xf]  ;;  %v2242_v31 = vld [vmem:[%s3244_s4 + $0x54] sm:$0xf0] }
 0x32b   :  { %1395 = vmatpush.bf16.msrb.mxu0 %v2915_v22  ;;  %v1102_v42 = vmax.f32 %v1055_v24, 0.0 }
 0x32f   :  { %1396 = vmatpush.bf16.msrb.mxu0 %v2900_v2 }
 0x330   :  { %v975_v28 = vpop.f32.mrf.mxu2  ;;  %v1056_v33 = vpop.f32.mrf.mxu3 }
 0x331   :  { %v1057_v9 = vadd.f32 %v1056_v33, %v973_v25  ;;  %v976_v2 = vadd.f32 %v975_v28, %v2848_v59  ;;  %v2086_v28 = vor.u32 %v2242_v31, %v2085_v57 }
 0x333   :  { %v1103_v44 = vmax.f32 %v1057_v9, 0.0  ;;  %1397 = vmatpush.bf16.msrb.mxu0 %v2885_v40 }
 0x335   :  { %v2990_v22 = vpack.c.bf16 %v1103_v44, %v1102_v42 }
 0x336   :  { %1398 = vmatmul.bf16.vlgmr.msrb.gmra.mxu0 %v2046_v41 }
 0x338   :  { %v977_v21 = vpop.f32.mrf.mxu2  ;;  %v1059_v45 = vpop.f32.mrf.mxu3 }
 0x339   :  { %v1060_v47 = vadd.f32 %v1059_v45, %v976_v2  ;;  %v978_v34 = vadd.f32 %v977_v21, %v2859_v0 }
 0x33b   :  { %v1104_v23 = vmax.f32 %v1060_v47, 0.0 }
 0x340   :  { %v980_v53 = vpop.f32.mrf.mxu2  ;;  %v1061_v40 = vpop.f32.mrf.mxu3 }
 0x341   :  { %v1062_v3 = vadd.f32 %v1061_v40, %v978_v34  ;;  %v981_v56 = vadd.f32 %v980_v53, %v2867_v8  ;;  %v2069_v8 = vld [vmem:[%s3244_s4 + $0x30] sm:$0xf] }
 0x342   :  { %v2070_v13 = vor.u32 %v2238_v30, %v2069_v8  ;;  %v2237_v30 = vld [vmem:[%s3244_s4 + $0x34] sm:$0xf] }
 0x343   :  { %v1105_v38 = vmax.f32 %v1062_v3, 0.0 }
 0x345   :  { %v3000_v59 = vpack.c.bf16 %v1105_v38, %v1104_v23  ;;  %v2047_v23 = vld [vmem:[%s3244_s4 + $0x8] sm:$0xf0] }
 0x346   :  { %1403 = vmatmul.bf16.gmra.mxu0 %v2054_v55  ;;  %v2231_v55 = vld [vmem:[%s3244_s4 + $0x4] sm:$0xf] }
 0x347   :  { %v2050_v38 = vor.u32 %v2231_v55, %v2047_v23  ;;  %v2249_v23 = vld [vmem:[%s3244_s4 + $0x94] sm:$0xf] }
 0x348   :  { %v982_v0 = vpop.f32.mrf.mxu2  ;;  %v1064_v61 = vpop.f32.mrf.mxu3 }
 0x349   :  { %v1065_v54 = vadd.f32 %v1064_v61, %v981_v56  ;;  %v983_v2 = vadd.f32 %v982_v0, %v2838_v52  ;;  %v2244_v52 = vld [vmem:[%s3244_s4 + $0x64] sm:$0xf0]  ;;  %v2101_v56 = vld [vmem:[%s3244_s4 + $0x70] sm:$0xf]  ;;  %v2233_v0 = vld [vmem:[%s3244_s4 + $0x14] sm:$0xf] }
 0x34b   :  { %v1106_v53 = vmax.f32 %v1065_v54, 0.0  ;;  %v2109_v54 = vld [vmem:[%s3244_s4 + $0x80] sm:$0xf] }
 0x34c   :  { %v2110_v63 = vor.u32 %v2248_v19, %v2109_v54 }
 0x350   :  { %v985_v6 = vpop.f32.mrf.mxu2  ;;  %v1066_v1 = vpop.f32.mrf.mxu3 }
 0x351   :  { %v986_v9 = vadd.f32 %v985_v6, %v2817_v46  ;;  %v2093_v46 = vld [vmem:[%s3244_s4 + $0x60] sm:$0xf]  ;;  %v2235_v6 = vld [vmem:[%s3244_s4 + $0x24] sm:$0xf] }
 0x352   :  { %v2094_v3 = vor.u32 %v2244_v52, %v2093_v46 }
 0x356   :  { %1408 = vmatmul.bf16.gmra.mxu0 %v2062_v49 }
 0x358   :  { %v987_v4 = vpop.f32.mrf.mxu2  ;;  %v1069_v10 = vpop.f32.mrf.mxu3 }
 0x359   :  { %v1070_v21 = vadd.f32 %v1069_v10, %v986_v9  ;;  %v2250_v10 = vld [vmem:[%s3244_s4 + $0x94] sm:$0xf0] }
 0x35b   :  { %v1108_v48 = vmax.f32 %v1070_v21, 0.0 }
 0x360   :  { %v990_v58 = vpop.f32.mrf.mxu2  ;;  %v1071_v12 = vpop.f32.mrf.mxu3 }
 0x361   :  { %v991_v25 = vadd.f32 %v990_v58, %v2794_v39  ;;  %v1067_v39 = vadd.f32 %v1066_v1, %v983_v2  ;;  %v2063_v1 = vld [vmem:[%s3244_s4 + $0x28] sm:$0xf0]  ;;  %v2071_v58 = vld [vmem:[%s3244_s4 + $0x38] sm:$0xf0] }
 0x362   :  { %v2066_v49 = vor.u32 %v2235_v6, %v2063_v1 }
 0x366   :  { %1413 = vmatmul.bf16.gmra.mxu0 %v2070_v13  ;;  %v2239_v13 = vld [vmem:[%s3244_s4 + $0x44] sm:$0xf] }
 0x368   :  { %v992_v37 = vpop.f32.mrf.mxu2  ;;  %v1074_v32 = vpop.f32.mrf.mxu3 }
 0x369   :  { %v993_v50 = vadd.f32 %v992_v37, %v2804_v43  ;;  %v1075_v43 = vadd.f32 %v1074_v32, %v991_v25  ;;  %v2079_v37 = vld [vmem:[%s3244_s4 + $0x48] sm:$0xf0] }
 0x36a   :  { %v2082_v32 = vor.u32 %v2239_v13, %v2079_v37 }
 0x36b   :  { %v1110_v45 = vmax.f32 %v1075_v43, 0.0 }
 0x370   :  { %v1076_v15 = vpop.f32.mrf.mxu3  ;;  %v995_v60 = vpop.f32.mrf.mxu2 }
 0x371   :  { %v996_v18 = vadd.f32 %v995_v60, %v2815_v35  ;;  %v1077_v29 = vadd.f32 %v1076_v15, %v993_v50  ;;  %v988_v35 = vadd.f32 %v987_v4, %v2857_v62  ;;  %v1107_v62 = vmax.f32 %v1067_v39, 0.0  ;;  %v2117_v4 = vld [vmem:[%s3244_s4 + $0x90] sm:$0xf]  ;;  %v3103_v60 = vpop.permute.xlu0 %1241 }
 0x372   :  { %v2118_v8 = vor.u32 %v2250_v10, %v2117_v4  ;;  %v2090_v15 = vor.u32 %v2241_v5, %v2087_v14 }
 0x373   :  { %v1072_v41 = vadd.f32 %v1071_v12, %v988_v35  ;;  %v1111_v42 = vmax.f32 %v1077_v29, 0.0  ;;  %v1125_v40 = vpack.c.bf16 %v1107_v62, %v1106_v53  ;;  %v2074_v12 = vor.u32 %v2237_v30, %v2071_v58  ;;  %v2245_v29 = vld [vmem:[%s3244_s4 + $0x74] sm:$0xf] }
 0x375   :  { %v1109_v47 = vmax.f32 %v1072_v41, 0.0  ;;  %v1127_v34 = vpack.c.bf16 %v1111_v42, %v1110_v45  ;;  %v2247_v42 = vld [vmem:[%s3244_s4 + $0x84] sm:$0xf] }
 0x376   :  { %1418 = vmatmul.bf16.gmra.mxu0 %v2078_v11  ;;  %v3105_v11 = vpop.permute.xlu2 %1231 }
 0x377   :  { %v1126_v51 = vpack.c.bf16 %v1109_v47, %v1108_v48 }
 0x378   :  { %v1079_v16 = vpop.f32.mrf.mxu3  ;;  %v997_v17 = vpop.f32.mrf.mxu2 }
 0x379   :  { %v998_v27 = vadd.f32 %v997_v17, %v2783_v26  ;;  %v1080_v36 = vadd.f32 %v1079_v16, %v996_v18  ;;  %v2243_v17 = vld [vmem:[%s3244_s4 + $0x64] sm:$0xf]  ;;  %v2095_v18 = vld [vmem:[%s3244_s4 + $0x68] sm:$0xf0]  ;;  %v3113_v50 = vpop.permute.xlu0 %1236 }
 0x37b   :  { %v1112_v33 = vmax.f32 %v1080_v36, 0.0 }
 0x37e   :  { %v3115_v36 = vpop.permute.xlu2 %1226 }
 0x380   :  { %v1081_v24 = vpop.f32.mrf.mxu3 }
 0x381   :  { %v1082_v7 = vadd.f32 %v1081_v24, %v998_v27  ;;  %v2098_v27 = vor.u32 %v2243_v17, %v2095_v18  ;;  %v3118_v31 = vpop.permute.xlu0 %1211 }
 0x383   :  { %v1113_v26 = vmax.f32 %v1082_v7, 0.0  ;;  %v2103_v7 = vld [vmem:[%s3244_s4 + $0x78] sm:$0xf0] }
 0x384   :  { %v2106_v35 = vor.u32 %v2245_v29, %v2103_v7 }
 0x385   :  { %v1128_v44 = vpack.c.bf16 %v1113_v26, %v1112_v33 }
 0x386   :  { %1423 = vmatmul.bf16.gmra.mxu0 %v2086_v28  ;;  %v1202_v24 = vpop.permute.xlu2 %1201  ;;  %v3126_v28 = vpop.permute.xlu1 %1246 }
 0x387   :  { %1450 = vmatpush.bf16.msrb.mxu1 %v1128_v44  ;;  %v2111_v44 = vld [vmem:[%s3244_s4 + $0x88] sm:$0xf0] }
 0x388   :  { %v2114_v39 = vor.u32 %v2247_v42, %v2111_v44 }
 0x389   :  { %v1207_v43 = vpop.permute.xlu0 %1206 }
 0x38b   :  { %1451 = vmatpush.bf16.msrb.mxu1 %v1127_v34 }
 0x38e   :  { %v1197_v33 = vpop.permute.xlu2 %1196  ;;  %v3129_v9 = vpop.permute.xlu1 %1221 }
 0x38f   :  { %1452 = vmatpush.bf16.msrb.mxu1 %v1126_v51 }
 0x391   :  { %v1182_v41 = vpop.permute.xlu0 %1181 }
 0x393   :  { %1453 = vmatpush.bf16.msrb.mxu1 %v1125_v40 }
 0x396   :  { %1428 = vmatmul.bf16.gmra.mxu0 %v2094_v3  ;;  %v1172_v2 = vpop.permute.xlu2 %1171  ;;  %v3137_v48 = vpop.permute.xlu1 %1216 }
 0x397   :  { %1454 = vmatpush.bf16.msrb.mxu1 %v3000_v59 }
 0x399   :  { %v1177_v62 = vpop.permute.xlu0 %1176 }
 0x39b   :  { %1455 = vmatpush.bf16.msrb.mxu1 %v2990_v22  ;;  %v2246_v22 = vld [vmem:[%s3244_s4 + $0x74] sm:$0xf0] }
 0x39c   :  { %v2102_v59 = vor.u32 %v2246_v22, %v2101_v56 }
 0x39e   :  { %v1192_v55 = vpop.permute.xlu1 %1191 }
 0x39f   :  { %1456 = vmatpush.bf16.msrb.mxu1 %v2978_v20  ;;  %v2055_v20 = vld [vmem:[%s3244_s4 + $0x18] sm:$0xf0] }
 0x3a0   :  { %v2058_v61 = vor.u32 %v2233_v0, %v2055_v20 }
 0x3a2   :  { %2123 = vmatmul.msk.bf16.vlgmr.msrb.gmra.mxu1 %vm1359_vm4, %v2050_v38  ;;  %v2119_v38 = vld [vmem:[%s3244_s4 + $0x98] sm:$0xf0] }
 0x3a6   :  { %1433 = vmatmul.bf16.gmra.mxu0 %v2102_v59  ;;  %v2122_v59 = vor.u32 %v2249_v23, %v2119_v38  ;;  %v1187_v54 = vpop.permute.xlu1 %1186 }
 0x3b2   :  { %2124 = vmatmul.msk.bf16.gmra.mxu1 %vm1359_vm4, %v2058_v61 }
 0x3b3   :  { %v1399_v16 = vpop.f32.mrf.mxu0 }
 0x3b4   :  { %v1400_v45 = vadd.f32 %v1399_v16, %v1172_v2 }
 0x3b6   :  { %1438 = vmatmul.bf16.gmra.mxu0 %v2110_v63 }
 0x3bb   :  { %v1401_v57 = vpop.f32.mrf.mxu0 }
 0x3bc   :  { %v1402_v51 = vadd.f32 %v1401_v57, %v1177_v62 }
 0x3c2   :  { %2125 = vmatmul.msk.bf16.gmra.mxu1 %vm1359_vm4, %v2066_v49 }
 0x3c3   :  { %v1404_v25 = vpop.f32.mrf.mxu0 }
 0x3c4   :  { %v1405_v22 = vadd.f32 %v1404_v25, %v1182_v41 }
 0x3c6   :  { %1443 = vmatmul.bf16.gmra.mxu0 %v2118_v8 }
 0x3cb   :  { %v1406_v26 = vpop.f32.mrf.mxu0 }
 0x3cc   :  { %v1407_v19 = vadd.f32 %v1406_v26, %v1187_v54 }
 0x3d2   :  { %2126 = vmatmul.msk.bf16.gmra.mxu1 %vm1359_vm4, %v2074_v12 }
 0x3d3   :  { %v1409_v21 = vpop.f32.mrf.mxu0 }
 0x3d4   :  { %v1410_v8 = vadd.f32 %v1409_v21, %v1192_v55 }
 0x3db   :  { %v1411_v53 = vpop.f32.mrf.mxu0 }
 0x3dc   :  { %v1412_v13 = vadd.f32 %v1411_v53, %v1197_v33 }
 0x3e2   :  { %2127 = vmatmul.msk.bf16.gmra.mxu1 %vm1359_vm4, %v2082_v32 }
 0x3e3   :  { %v1414_v61 = vpop.f32.mrf.mxu0 }
 0x3e4   :  { %v1415_v16 = vadd.f32 %v1414_v61, %v1202_v24 }
 0x3eb   :  { %v1416_v4 = vpop.f32.mrf.mxu0 }
 0x3ec   :  { %v1417_v57 = vadd.f32 %v1416_v4, %v1207_v43 }
 0x3f2   :  { %2128 = vmatmul.msk.bf16.gmra.mxu1 %vm1359_vm4, %v2090_v15 }
 0x3f3   :  { %v1419_v12 = vpop.f32.mrf.mxu0 }
 0x3f4   :  { %v1420_v42 = vadd.f32 %v1419_v12, %v3118_v31 }
 0x3fb   :  { %v1421_v17 = vpop.f32.mrf.mxu0 }
 0x402   :  { %2129 = vmatmul.msk.bf16.gmra.mxu1 %vm1359_vm4, %v2098_v27 }
 0x403   :  { %v1424_v7 = vpop.f32.mrf.mxu0 }
 0x404   :  { %v1425_v54 = vadd.f32 %v1424_v7, %v3129_v9  ;;  %v1252_v7 = vpop.permute.xlu0 %1251 }
 0x40b   :  { %v1426_v2 = vpop.f32.mrf.mxu0 }
 0x412   :  { %2130 = vmatmul.msk.bf16.gmra.mxu1 %vm1359_vm4, %v2106_v35 }
 0x41f   :  { %v1458_v47 = vpop.f32.mrf.mxu1 }
 0x420   :  { %v1459_v34 = vadd.f32 %v1458_v47, %v1400_v45  ;;  %v1429_v45 = vpop.f32.mrf.mxu0 }
 0x421   :  { %v1430_v23 = vadd.f32 %v1429_v45, %v3105_v11 }
 0x422   :  { %2131 = vmatmul.msk.bf16.gmra.mxu1 %vm1359_vm4, %v2114_v39  ;;  %v1508_v40 = vmax.f32 %v1459_v34, 0.0 }
 0x427   :  { %v1460_v46 = vpop.f32.mrf.mxu1 }
 0x428   :  { %v1461_v52 = vadd.f32 %v1460_v46, %v1402_v51  ;;  %v1431_v47 = vpop.f32.mrf.mxu0 }
 0x42a   :  { %v1509_v3 = vmax.f32 %v1461_v52, 0.0 }
 0x42c   :  { %v3146_v56 = vpack.c.bf16 %v1509_v3, %v1508_v40  ;;  %v1432_v40 = vadd.f32 %v1431_v47, %v3113_v50  ;;  %v1422_v50 = vadd.f32 %v1421_v17, %v3137_v48  ;;  %v2137_v47 = vld [vmem:[%s3245_s5 + $0x8] sm:$0xf0] }
 0x42f   :  { %v1463_v0 = vpop.f32.mrf.mxu1 }
 0x430   :  { %v1464_v20 = vadd.f32 %v1463_v0, %v1405_v22  ;;  %v1434_v62 = vpop.f32.mrf.mxu0 }
 0x431   :  { %v1435_v46 = vadd.f32 %v1434_v62, %v3103_v60  ;;  %v2254_v62 = vld [vmem:[%s3245_s5 + $0x14] sm:$0xf0] }
 0x432   :  { %2132 = vmatmul.msk.bf16.gmra.mxu1 %vm1359_vm4, %v2122_v59  ;;  %v1510_v1 = vmax.f32 %v1464_v20, 0.0  ;;  %v1427_v59 = vadd.f32 %v1426_v2, %v3115_v36 }
 0x437   :  { %v1465_v63 = vpop.f32.mrf.mxu1 }
 0x438   :  { %v1466_v6 = vadd.f32 %v1465_v63, %v1407_v19  ;;  %v1436_v43 = vpop.f32.mrf.mxu0 }
 0x439   :  { %v1437_v31 = vadd.f32 %v1436_v43, %v3126_v28  ;;  %v2253_v43 = vld [vmem:[%s3245_s5 + $0x14] sm:$0xf] }
 0x43a   :  { %v1511_v49 = vmax.f32 %v1466_v6, 0.0 }
 0x43c   :  { %v3149_v10 = vpack.c.bf16 %v1511_v49, %v1510_v1 }
 0x43f   :  { %v1468_v30 = vpop.f32.mrf.mxu1 }
 0x440   :  { %v1469_v58 = vadd.f32 %v1468_v30, %v1410_v8  ;;  %v1439_v52 = vpop.f32.mrf.mxu0 }
 0x442   :  { %v1512_v5 = vmax.f32 %v1469_v58, 0.0 }
 0x447   :  { %v1470_v37 = vpop.f32.mrf.mxu1 }
 0x448   :  { %v1471_v32 = vadd.f32 %v1470_v37, %v1412_v13  ;;  %v1441_v1 = vpop.f32.mrf.mxu0 }
 0x44a   :  { %v1513_v14 = vmax.f32 %v1471_v32, 0.0  ;;  %v1262_v32 = vpop.permute.xlu1 %1261 }
 0x44c   :  { %v3151_v15 = vpack.c.bf16 %v1513_v14, %v1512_v5 }
 0x44f   :  { %v1473_v18 = vpop.f32.mrf.mxu1 }
 0x450   :  { %v1474_v27 = vadd.f32 %v1473_v18, %v1415_v16  ;;  %v1444_v37 = vpop.f32.mrf.mxu0  ;;  %v1267_v16 = vpop.permute.xlu2 %1266 }
 0x451   :  { %v1445_v14 = vadd.f32 %v1444_v37, %v1262_v32 }
 0x452   :  { %v1514_v35 = vmax.f32 %v1474_v27, 0.0  ;;  %v1257_v17 = vpop.permute.xlu1 %1256 }
 0x453   :  { %v1442_v18 = vadd.f32 %v1441_v1, %v1257_v17 }
 0x457   :  { %v1475_v25 = vpop.f32.mrf.mxu1 }
 0x458   :  { %v1476_v29 = vadd.f32 %v1475_v25, %v1417_v57  ;;  %v1446_v5 = vpop.f32.mrf.mxu0  ;;  %v2135_v25 = vld [vmem:[%s3245_s5] sm:$0xf] }
 0x459   :  { %v1447_v27 = vadd.f32 %v1446_v5, %v1267_v16 }
 0x45a   :  { %v1515_v26 = vmax.f32 %v1476_v29, 0.0  ;;  %v2252_v29 = vld [vmem:[%s3245_s5 + $0x4] sm:$0xf0]  ;;  %v1591_v1 = vpop.permute.xlu1 %1590 }
 0x45c   :  { %v1531_v41 = vpack.c.bf16 %v1515_v26, %v1514_v35 }
 0x45f   :  { %v1478_v33 = vpop.f32.mrf.mxu1 }
 0x460   :  { %v1479_v44 = vadd.f32 %v1478_v33, %v1420_v42  ;;  %v2136_v42 = vor.u32 %v2252_v29, %v2135_v25 }
 0x462   :  { %v1516_v12 = vmax.f32 %v1479_v44, 0.0 }
 0x467   :  { %v1480_v21 = vpop.f32.mrf.mxu1 }
 0x468   :  { %v1481_v11 = vadd.f32 %v1480_v21, %v1422_v50  ;;  %v2169_v50 = vld [vmem:[%s3245_s5 + $0x48] sm:$0xf0] }
 0x46a   :  { %v1517_v36 = vmax.f32 %v1481_v11, 0.0  ;;  %v1586_v11 = vpop.permute.xlu1 %1585 }
 0x46c   :  { %v1532_v13 = vpack.c.bf16 %v1517_v36, %v1516_v12 }
 0x46f   :  { %v1483_v39 = vpop.f32.mrf.mxu1 }
 0x470   :  { %v1484_v6 = vadd.f32 %v1483_v39, %v1425_v54  ;;  %v2251_v39 = vld [vmem:[%s3245_s5 + $0x4] sm:$0xf]  ;;  %v2167_v54 = vld [vmem:[%s3245_s5 + $0x40] sm:$0xf] }
 0x472   :  { %v1518_v30 = vmax.f32 %v1484_v6, 0.0 }
 0x477   :  { %v1485_v24 = vpop.f32.mrf.mxu1 }
 0x478   :  { %v1486_v19 = vadd.f32 %v1485_v24, %v1427_v59 }
 0x47a   :  { %v1519_v4 = vmax.f32 %v1486_v19, 0.0  ;;  %v2260_v19 = vld [vmem:[%s3245_s5 + $0x44] sm:$0xf0] }
 0x47c   :  { %v1533_v58 = vpack.c.bf16 %v1519_v4, %v1518_v30 }
 0x47f   :  { %v1488_v34 = vpop.f32.mrf.mxu1 }
 0x480   :  { %v1489_v0 = vadd.f32 %v1488_v34, %v1430_v23  ;;  %v2140_v34 = vor.u32 %v2251_v39, %v2137_v47 }
 0x482   :  { %v1520_v28 = vmax.f32 %v1489_v0, 0.0  ;;  %v2257_v0 = vld [vmem:[%s3245_s5 + $0x34] sm:$0xf] }
 0x487   :  { %v1490_v51 = vpop.f32.mrf.mxu1 }
 0x488   :  { %v1491_v38 = vadd.f32 %v1490_v51, %v1432_v40  ;;  %v2256_v40 = vld [vmem:[%s3245_s5 + $0x24] sm:$0xf0] }
 0x48a   :  { %v1521_v60 = vmax.f32 %v1491_v38, 0.0  ;;  %v2159_v38 = vld [vmem:[%s3245_s5 + $0x30] sm:$0xf] }
 0x48c   :  { %v1534_v8 = vpack.c.bf16 %v1521_v60, %v1520_v28  ;;  %v2168_v60 = vor.u32 %v2260_v19, %v2167_v54  ;;  %v1601_v28 = vpop.permute.xlu2 %1600 }
 0x48f   :  { %v1493_v53 = vpop.f32.mrf.mxu1 }
 0x490   :  { %v1494_v3 = vadd.f32 %v1493_v53, %v1435_v46  ;;  %v2145_v53 = vld [vmem:[%s3245_s5 + $0x18] sm:$0xf0] }
 0x491   :  { %v2148_v46 = vor.u32 %v2253_v43, %v2145_v53 }
 0x492   :  { %v1522_v20 = vmax.f32 %v1494_v3, 0.0  ;;  %v2255_v3 = vld [vmem:[%s3245_s5 + $0x24] sm:$0xf] }
 0x497   :  { %v1495_v55 = vpop.f32.mrf.mxu1 }
 0x498   :  { %v1496_v22 = vadd.f32 %v1495_v55, %v1437_v31  ;;  %v2153_v55 = vld [vmem:[%s3245_s5 + $0x28] sm:$0xf0] }
 0x499   :  { %v2156_v23 = vor.u32 %v2255_v3, %v2153_v55 }
 0x49a   :  { %v1523_v61 = vmax.f32 %v1496_v22, 0.0  ;;  %v2258_v22 = vld [vmem:[%s3245_s5 + $0x34] sm:$0xf0] }
 0x49b   :  { %v2160_v59 = vor.u32 %v2258_v22, %v2159_v38 }
 0x49c   :  { %v1535_v63 = vpack.c.bf16 %v1523_v61, %v1522_v20  ;;  %v2161_v20 = vld [vmem:[%s3245_s5 + $0x38] sm:$0xf0] }
 0x49d   :  { %v2164_v61 = vor.u32 %v2257_v0, %v2161_v20 }
 0x49e   :  { %1668 = vmatpush.bf16.msrb.mxu3 %v1535_v63  ;;  %v2259_v63 = vld [vmem:[%s3245_s5 + $0x44] sm:$0xf] }
 0x49f   :  { %v1498_v49 = vpop.f32.mrf.mxu1  ;;  %v2172_v6 = vor.u32 %v2259_v63, %v2169_v50 }
 0x4a2   :  { %1669 = vmatpush.bf16.msrb.mxu3 %v1534_v8  ;;  %v1561_v8 = vpop.permute.xlu1 %1560 }
 0x4a6   :  { %1670 = vmatpush.bf16.msrb.mxu3 %v1533_v58 }
 0x4a7   :  { %v1500_v9 = vpop.f32.mrf.mxu1 }
 0x4a8   :  { %v1501_v26 = vadd.f32 %v1500_v9, %v1442_v18 }
 0x4aa   :  { %1671 = vmatpush.bf16.msrb.mxu3 %v1532_v13 }
 0x4ae   :  { %1672 = vmatpush.bf16.msrb.mxu3 %v1531_v41 }
 0x4af   :  { %v1503_v48 = vpop.f32.mrf.mxu1 }
 0x4b0   :  { %v1504_v57 = vadd.f32 %v1503_v48, %v1445_v14 }
 0x4b2   :  { %1673 = vmatpush.bf16.msrb.mxu3 %v3151_v15  ;;  %v1440_v15 = vadd.f32 %v1439_v52, %v1252_v7  ;;  %v1526_v44 = vmax.f32 %v1504_v57, 0.0  ;;  %v2151_v52 = vld [vmem:[%s3245_s5 + $0x20] sm:$0xf] }
 0x4b3   :  { %v2152_v31 = vor.u32 %v2256_v40, %v2151_v52 }
 0x4b4   :  { %v1499_v33 = vadd.f32 %v1498_v49, %v1440_v15  ;;  %v1596_v49 = vpop.permute.xlu2 %1595 }
 0x4b6   :  { %1674 = vmatpush.bf16.msrb.mxu3 %v3149_v10  ;;  %v1525_v10 = vmax.f32 %v1501_v26, 0.0  ;;  %v1524_v45 = vmax.f32 %v1499_v33, 0.0 }
 0x4b7   :  { %v1505_v35 = vpop.f32.mrf.mxu1 }
 0x4b8   :  { %v1506_v41 = vadd.f32 %v1505_v35, %v1447_v27  ;;  %v1536_v24 = vpack.c.bf16 %v1525_v10, %v1524_v45 }
 0x4ba   :  { %v1527_v2 = vmax.f32 %v1506_v41, 0.0  ;;  %1675 = vmatpush.bf16.msrb.mxu3 %v3146_v56  ;;  %v2143_v56 = vld [vmem:[%s3245_s5 + $0x10] sm:$0xf] }
 0x4bb   :  { %v2144_v51 = vor.u32 %v2254_v62, %v2143_v56 }
 0x4bc   :  { %v1537_v21 = vpack.c.bf16 %v1527_v2, %v1526_v44  ;;  %v1571_v4 = vpop.permute.xlu2 %1570  ;;  %v1606_v44 = vpop.permute.xlu0 %1605 }
 0x4bd   :  { %1676 = vmatmul.bf16.vlgmr.msrb.gmra.mxu3 %v2136_v42 }
 0x4be   :  { %1708 = vmatpush.bf16.msra.mxu0 %v1537_v21 }
 0x4c2   :  { %1709 = vmatpush.bf16.msra.mxu0 %v1536_v24 }
 0x4c4   :  { %v1566_v9 = vpop.permute.xlu2 %1565  ;;  %v1581_v45 = vpop.permute.xlu0 %1580 }
 0x4c5   :  { %2173 = vmatmul.msk.bf16.vlgmr.msra.gmra.mxu0 %vm870_vm3, %v2140_v34 }
 0x4cc   :  { %v1576_v55 = vpop.permute.xlu0 %1575 }
 0x4cd   :  { %1681 = vmatmul.bf16.gmra.mxu3 %v2144_v51 }
 0x4d5   :  { %2174 = vmatmul.msk.bf16.gmra.mxu0 %vm870_vm3, %v2148_v46 }
 0x4dd   :  { %1686 = vmatmul.bf16.gmra.mxu3 %v2152_v31 }
 0x4e5   :  { %2175 = vmatmul.msk.bf16.gmra.mxu0 %vm870_vm3, %v2156_v23 }
 0x4ed   :  { %1691 = vmatmul.bf16.gmra.mxu3 %v2160_v59 }
 0x4f5   :  { %2176 = vmatmul.msk.bf16.gmra.mxu0 %vm870_vm3, %v2164_v61 }
 0x4fd   :  { %1696 = vmatmul.bf16.gmra.mxu3 %v2168_v60 }
 0x505   :  { %2177 = vmatmul.msk.bf16.gmra.mxu0 %vm870_vm3, %v2172_v6 }
 0x540   :  { %v1677_v30 = vpop.f32.mrf.mxu3 }
 0x541   :  { %v1678_v36 = vadd.f32 %v1677_v30, %v1561_v8  ;;  %v1760_v8 = vpop.permute.xlu0 %1759 }
 0x542   :  { %v1711_v58 = vpop.f32.mrf.mxu0 }
 0x543   :  { %v1712_v12 = vadd.f32 %v1711_v58, %v1678_v36  ;;  %v1765_v58 = vpop.permute.xlu1 %1764 }
 0x545   :  { %v1736_v5 = vmax.f32 %v1712_v12, 0.0 }
 0x548   :  { %v1679_v13 = vpop.f32.mrf.mxu3 }
 0x549   :  { %v1680_v37 = vadd.f32 %v1679_v13, %v1566_v9  ;;  %v1770_v13 = vpop.permute.xlu2 %1769 }
 0x54a   :  { %v1713_v32 = vpop.f32.mrf.mxu0 }
 0x54b   :  { %v1714_v48 = vadd.f32 %v1713_v32, %v1680_v37 }
 0x54d   :  { %v1737_v14 = vmax.f32 %v1714_v48, 0.0 }
 0x54f   :  { %v1746_v16 = vpack.c.bf16 %v1737_v14, %v1736_v5 }
 0x550   :  { %v1682_v17 = vpop.f32.mrf.mxu3 }
 0x551   :  { %v1683_v18 = vadd.f32 %v1682_v17, %v1571_v4 }
 0x552   :  { %v1716_v27 = vpop.f32.mrf.mxu0 }
 0x553   :  { %v1717_v57 = vadd.f32 %v1716_v27, %v1683_v18 }
 0x555   :  { %v1738_v6 = vmax.f32 %v1717_v57, 0.0 }
 0x558   :  { %v1684_v25 = vpop.f32.mrf.mxu3 }
 0x559   :  { %v1685_v23 = vadd.f32 %v1684_v25, %v1576_v55 }
 0x55a   :  { %v1718_v29 = vpop.f32.mrf.mxu0 }
 0x55b   :  { %v1719_v61 = vadd.f32 %v1718_v29, %v1685_v23 }
 0x55d   :  { %v1739_v63 = vmax.f32 %v1719_v61, 0.0 }
 0x560   :  { %v1687_v7 = vpop.f32.mrf.mxu3 }
 0x561   :  { %v1688_v52 = vadd.f32 %v1687_v7, %v1581_v45 }
 0x562   :  { %v1721_v35 = vpop.f32.mrf.mxu0 }
 0x563   :  { %v1722_v0 = vadd.f32 %v1721_v35, %v1688_v52 }
 0x565   :  { %v1740_v60 = vmax.f32 %v1722_v0, 0.0 }
 0x568   :  { %v1689_v15 = vpop.f32.mrf.mxu3 }
 0x569   :  { %v1690_v43 = vadd.f32 %v1689_v15, %v1586_v11 }
 0x56a   :  { %v1723_v26 = vpop.f32.mrf.mxu0 }
 0x56b   :  { %v1724_v38 = vadd.f32 %v1723_v26, %v1690_v43 }
 0x56d   :  { %v1741_v54 = vmax.f32 %v1724_v38, 0.0 }
 0x56f   :  { %v1748_v50 = vpack.c.bf16 %v1741_v54, %v1740_v60 }
 0x570   :  { %v1692_v41 = vpop.f32.mrf.mxu3 }
 0x571   :  { %v1693_v34 = vadd.f32 %v1692_v41, %v1591_v1  ;;  %v2261_v1 = vld [vmem:[%s3246_s6] sm:$0xff] }
 0x572   :  { %v1726_v42 = vpop.f32.mrf.mxu0 }
 0x573   :  { %v1727_v40 = vadd.f32 %v1726_v42, %v1693_v34 }
 0x575   :  { %v1742_v20 = vmax.f32 %v1727_v40, 0.0 }
 0x578   :  { %v1694_v33 = vpop.f32.mrf.mxu3 }
 0x579   :  { %v1695_v47 = vadd.f32 %v1694_v33, %v1596_v49  ;;  %v1753_v49 = vld [vmem:[%s3246_s6 + $0x8] sm:$0xf]  ;;  %s2297_s6 = smov 128  }
 0x57a   :  { %v1728_v2 = vpop.f32.mrf.mxu0  ;;  %v1777_v11 = vunpack.c.l.b16 %v1753_v49 }
 0x57b   :  { %v1729_v53 = vadd.f32 %v1728_v2, %v1695_v47 }
 0x57c   :  { %v1779_v4 = vpack.c.b16 %v1777_v11, %v1777_v11 }
 0x57d   :  { %v1743_v22 = vmax.f32 %v1729_v53, 0.0 }
 0x57f   :  { %v1749_v19 = vpack.c.bf16 %v1743_v22, %v1742_v20 }
 0x580   :  { %v1697_v10 = vpop.f32.mrf.mxu3 }
 0x581   :  { %v1698_v39 = vadd.f32 %v1697_v10, %v1601_v28  ;;  %v1747_v28 = vpack.c.bf16 %v1739_v63, %v1738_v6 }
 0x582   :  { %v1731_v21 = vpop.f32.mrf.mxu0 }
 0x583   :  { %v1732_v56 = vadd.f32 %v1731_v21, %v1698_v39 }
 0x585   :  { %v1744_v31 = vmax.f32 %v1732_v56, 0.0 }
 0x588   :  { %v1699_v24 = vpop.f32.mrf.mxu3 }
 0x589   :  { %v1700_v62 = vadd.f32 %v1699_v24, %v1606_v44 }
 0x58a   :  { %v1733_v51 = vpop.f32.mrf.mxu0 }
 0x58b   :  { %v1734_v46 = vadd.f32 %v1733_v51, %v1700_v62 }
 0x58d   :  { %v1745_v3 = vmax.f32 %v1734_v46, 0.0 }
 0x58f   :  { %v1750_v59 = vpack.c.bf16 %v1745_v3, %v1744_v31 }
 0x591   :  { %1789 = vmatpush.bf16.msrb.mxu2 %v1750_v59 }
 0x595   :  { %1790 = vmatpush.bf16.msrb.mxu2 %v1749_v19 }
 0x599   :  { %1791 = vmatpush.bf16.msrb.mxu2 %v1748_v50 }
 0x59d   :  { %1792 = vmatpush.bf16.msrb.mxu2 %v1747_v28 }
 0x5a1   :  { %1793 = vmatpush.bf16.msrb.mxu2 %v1746_v16 }
 0x5a4   :  { %2182 = vmatmul.msk.bf16.vlgmr.msrb.gmra.mxu2 %vm405_vm2, %v2261_v1 }
 0x5b4   :  { %2183 = vmatmul.msk.bf16.gmra.mxu2 %vm405_vm2, %v1779_v4 }
 0x627   :  { %v1795_v30 = vpop.f32.mrf.mxu2 }
 0x628   :  { %v1796_v36 = vadd.f32 %v1795_v30, %v1760_v8 }
 0x62a   :  { %1804 = vst [vmem:[#allocation2] sm:$0xff] %v1796_v36 }
 0x62f   :  { %v1797_v12 = vpop.f32.mrf.mxu2 }
 0x630   :  { %v1798_v9 = vadd.f32 %v1797_v12, %v1765_v58 }
 0x632   :  { %1805 = vst [vmem:[#allocation2 + $0x8] sm:$0xff] %v1798_v9 }
 0x637   :  { %v1800_v37 = vpop.f32.mrf.mxu2 }
 0x638   :  { %v1801_v32 = vadd.f32 %v1800_v37, %v1770_v13 }
 0x63a   :  { %1806 = vst [vmem:[#allocation2 + $0x10] sm:$0xff] %v1801_v32 }
 0x63b   :  { %1819 = dma.vmem_to_hbm [thread:$0]  %s1812_s15, 384, %s1814_s18, [#allocation3], %s2297_s6, %s2297_s6, %s2298_s19  }
 0x63f   :  { %v1802_v48 = vpop.f32.mrf.mxu2 }
 0x640   :  { %2293 = dma.done.wait [#allocation3], 384  }
 0x641   :  { %2294 = vsyncadd [#allocation3], 4294966912 }
 0x642   :  { %1824 = vsyncpa [#allocation3], 1 }

</bundles_post_ra>
